<compile_context>
chip_gen: v6e
topology: v6e:2x2x1
jax: 0.10.0
libtpu: 0.0.40
codegen_flags: <defaults>
</compile_context>

<pallas_src>
import math

import jax
import jax.numpy as jnp
from jax.experimental import pallas as pl
from jax.experimental.pallas import tpu as pltpu

# --- model hyper-parameters (small, consistent with the module) -------------
B = 2          # batch
S = 8          # target sequence length
S_ENC = 8      # encoder (source) sequence length
D_MODEL = 32
NUM_HEADS = 4
D_FF = 64
D_K = D_MODEL // NUM_HEADS
LN_EPS = 1e-5          # nn.LayerNorm default eps
NEG_INF = -1e9         # masked_fill value used by the module
VEC_W = 3 * D_MODEL    # lane width of the packed bias/LN slab (widest row = fused QKV bias)


# ---------------------------------------------------------------------------
# Pallas kernel: full DecoderLayer forward, all batch elements in one step
# ---------------------------------------------------------------------------
def decoder_layer_kernel(x_ref, enc_ref, tgt_mask_ref, src_mask_ref,
                         w96_ref, w64_ref, w32_ref, vec_ref, out_ref):
    b, s, d = x_ref.shape
    s_enc = enc_ref.shape[1]

    # ---- unpack weights (host already transposed them to (in, out)) --------
    w_sa_qkv = w96_ref[...]                              # (D, 3D), scale folded into Q cols
    w_ca_kv = w64_ref[0:D_MODEL, :]                      # (D, 2D)
    w_ff1 = w64_ref[D_MODEL:2 * D_MODEL, :]              # (D, D_FF)
    w_ca_q = w32_ref[0:D_MODEL, :]                       # (D, D), scale folded in
    w_sa_o = w32_ref[D_MODEL:2 * D_MODEL, :]             # (D, D)
    w_ca_o = w32_ref[2 * D_MODEL:3 * D_MODEL, :]         # (D, D)
    w_ff2 = w32_ref[3 * D_MODEL:3 * D_MODEL + D_FF, :]   # (D_FF, D)

    def vrow(i, width):                                  # (1, width)
        return vec_ref[i:i + 1, 0:width]

    b_sa_qkv = vrow(0, 3 * D_MODEL)
    b_ca_q = vrow(1, D_MODEL)
    b_ca_kv = vrow(2, 2 * D_MODEL)
    b_sa_o = vrow(3, D_MODEL)
    b_ca_o = vrow(4, D_MODEL)
    b_ff1 = vrow(5, D_FF)
    b_ff2 = vrow(6, D_MODEL)
    ln1_g, ln1_b = vrow(7, D_MODEL), vrow(8, D_MODEL)
    ln2_g, ln2_b = vrow(9, D_MODEL), vrow(10, D_MODEL)
    ln3_g, ln3_b = vrow(11, D_MODEL), vrow(12, D_MODEL)

    # ---- activations: fold batch into the matmul row dimension -------------
    x2 = x_ref[...].reshape(b * s, d)                    # (B*S, D)
    enc2 = enc_ref[...].reshape(b * s_enc, d)            # (B*S_ENC, D)

    def layer_norm(y, g, beta):
        mu = jnp.mean(y, axis=-1, keepdims=True)
        var = jnp.mean((y - mu) ** 2, axis=-1, keepdims=True)
        return (y - mu) * jax.lax.rsqrt(var + LN_EPS) * g + beta

    def attention(Q2, K2, V2, wo, bo, mask, sk):
        """Q2: (B*S, D) (scale already folded in), K2/V2: (B*sk, D),
        mask: (S, sk) with 0 => masked."""
        Q3 = Q2.reshape(b, s, d)
        K3 = K2.reshape(b, sk, d)
        V3 = V2.reshape(b, sk, d)

        # additive mask bias: computed + broadcast once, reused by every head
        bias = jnp.broadcast_to(
            jnp.where(mask == 0.0, NEG_INF, 0.0)[None, :, :], (b, s, sk))

        heads = []
        for h in range(NUM_HEADS):         # static head loop, static lane slices
            sl = slice(h * D_K, (h + 1) * D_K)
            scores = jnp.einsum('bqd,bkd->bqk', Q3[:, :, sl], K3[:, :, sl],
                                preferred_element_type=jnp.float32) + bias
            m = jnp.max(scores, axis=-1, keepdims=True)
            p = jnp.exp(scores - m)
            denom = jnp.sum(p, axis=-1, keepdims=True)
            p = p * pl.reciprocal(denom, approx=False)        # EUP, not VPU divide
            heads.append(jnp.einsum('bqk,bkd->bqd', p, V3[:, :, sl],
                                    preferred_element_type=jnp.float32))
        # head concat along lanes -> one full-width W_o matmul
        ctx = jnp.concatenate(heads, axis=-1).reshape(b * s, d)
        return jnp.dot(ctx, wo, preferred_element_type=jnp.float32) + bo

    # 1) masked self-attention (fused QKV projection) + residual + LayerNorm
    qkv = jnp.dot(x2, w_sa_qkv, preferred_element_type=jnp.float32) + b_sa_qkv
    attn = attention(qkv[:, 0:D_MODEL],
                     qkv[:, D_MODEL:2 * D_MODEL],
                     qkv[:, 2 * D_MODEL:3 * D_MODEL],
                     w_sa_o, b_sa_o, tgt_mask_ref[...], s)
    x2 = layer_norm(x2 + attn, ln1_g, ln1_b)

    # 2) cross-attention over encoder output (fused KV projection) + res + LN
    q = jnp.dot(x2, w_ca_q, preferred_element_type=jnp.float32) + b_ca_q
    kv = jnp.dot(enc2, w_ca_kv, preferred_element_type=jnp.float32) + b_ca_kv
    cross = attention(q, kv[:, 0:D_MODEL], kv[:, D_MODEL:2 * D_MODEL],
                      w_ca_o, b_ca_o, src_mask_ref[...], s_enc)
    x2 = layer_norm(x2 + cross, ln2_g, ln2_b)

    # 3) position-wise feed-forward + residual + LayerNorm
    hdn = jnp.maximum(
        jnp.dot(x2, w_ff1, preferred_element_type=jnp.float32) + b_ff1, 0.0)
    ff = jnp.dot(hdn, w_ff2, preferred_element_type=jnp.float32) + b_ff2
    x2 = layer_norm(x2 + ff, ln3_g, ln3_b)

    out_ref[...] = x2.reshape(b, s, d).astype(out_ref.dtype)


# ---------------------------------------------------------------------------
# host-side parameter packing (done once, outside the hot path)
# ---------------------------------------------------------------------------
def pack_params(p):
    scale = 1.0 / math.sqrt(D_K)

    # all (out, in) nn.Linear weights -> (in, out); 1/sqrt(d_k) folded into W_q
    w96 = jnp.concatenate(
        [p["sa_wq"].T * scale, p["sa_wk"].T, p["sa_wv"].T],
        axis=1).astype(jnp.float32)                                  # (D, 3D)
    w64 = jnp.concatenate([
        jnp.concatenate([p["ca_wk"].T, p["ca_wv"].T], axis=1),       # (D, 2D)
        p["ff_w1"].T,                                                # (D, D_FF)
    ], axis=0).astype(jnp.float32)                                   # (2D, 64)
    w32 = jnp.concatenate([
        p["ca_wq"].T * scale, p["sa_wo"].T, p["ca_wo"].T, p["ff_w2"].T,
    ], axis=0).astype(jnp.float32)                                   # (3D + D_FF, D)

    def row(v):
        v = jnp.asarray(v, jnp.float32).reshape(1, -1)
        return jnp.pad(v, ((0, 0), (0, VEC_W - v.shape[1])))

    vec = jnp.concatenate([
        row(jnp.concatenate([p["sa_bq"] * scale, p["sa_bk"], p["sa_bv"]])),
        row(p["ca_bq"] * scale),
        row(jnp.concatenate([p["ca_bk"], p["ca_bv"]])),
        row(p["sa_bo"]), row(p["ca_bo"]),
        row(p["ff_b1"]), row(p["ff_b2"]),
        row(p["ln1_g"]), row(p["ln1_b"]),
        row(p["ln2_g"]), row(p["ln2_b"]),
        row(p["ln3_g"]), row(p["ln3_b"]),
    ], axis=0)                                                       # (13, 96)
    return w96, w64, w32, vec


# ---------------------------------------------------------------------------
# wrapper: single pallas_call, no grid, everything resident in VMEM
# ---------------------------------------------------------------------------
def decoder_layer(x, enc, tgt_mask, src_mask, p):
    b, s, d = x.shape
    w96, w64, w32, vec = pack_params(p)

    vmem = lambda: pl.BlockSpec(memory_space=pltpu.MemorySpace.VMEM)
    return pl.pallas_call(
        decoder_layer_kernel,
        out_shape=jax.ShapeDtypeStruct((b, s, d), x.dtype),
        in_specs=[vmem() for _ in range(8)],
        out_specs=vmem(),
    )(x, enc, tgt_mask, src_mask, w96, w64, w32, vec)


# ---------------------------------------------------------------------------
# deterministic parameter init (same shapes as the PyTorch module)
# ---------------------------------------------------------------------------
def _linear_params(key, out_dim, in_dim):
    kw, kb = jax.random.split(key)
    bound = 1.0 / math.sqrt(in_dim)
    w = jax.random.uniform(kw, (out_dim, in_dim), jnp.float32, -bound, bound)
    b = jax.random.uniform(kb, (out_dim,), jnp.float32, -bound, bound)
    return w, b


def init_params(key):
    ks = jax.random.split(key, 10)
    p = {}
    p["sa_wq"], p["sa_bq"] = _linear_params(ks[0], D_MODEL, D_MODEL)
    p["sa_wk"], p["sa_bk"] = _linear_params(ks[1], D_MODEL, D_MODEL)
    p["sa_wv"], p["sa_bv"] = _linear_params(ks[2], D_MODEL, D_MODEL)
    p["sa_wo"], p["sa_bo"] = _linear_params(ks[3], D_MODEL, D_MODEL)
    p["ca_wq"], p["ca_bq"] = _linear_params(ks[4], D_MODEL, D_MODEL)
    p["ca_wk"], p["ca_bk"] = _linear_params(ks[5], D_MODEL, D_MODEL)
    p["ca_wv"], p["ca_bv"] = _linear_params(ks[6], D_MODEL, D_MODEL)
    p["ca_wo"], p["ca_bo"] = _linear_params(ks[7], D_MODEL, D_MODEL)
    p["ff_w1"], p["ff_b1"] = _linear_params(ks[8], D_FF, D_MODEL)
    p["ff_w2"], p["ff_b2"] = _linear_params(ks[9], D_MODEL, D_FF)
    for i in (1, 2, 3):
        p[f"ln{i}_g"] = jnp.ones((D_MODEL,), jnp.float32)
        p[f"ln{i}_b"] = jnp.zeros((D_MODEL,), jnp.float32)
    return p


# ---------------------------------------------------------------------------
# pure-JAX reference (mirrors the PyTorch forward exactly; dropout = identity)
# ---------------------------------------------------------------------------
def decoder_layer_ref(x, enc, tgt_mask, src_mask, p):
    def ln(y, g, b):
        mu = jnp.mean(y, -1, keepdims=True)
        var = jnp.mean((y - mu) ** 2, -1, keepdims=True)
        return (y - mu) / jnp.sqrt(var + LN_EPS) * g + b

    def mha(q_in, k_in, v_in, pre, mask):
        bsz, sq, d = q_in.shape
        sk = k_in.shape[1]
        Q = q_in @ p[pre + "_wq"].T + p[pre + "_bq"]
        K = k_in @ p[pre + "_wk"].T + p[pre + "_bk"]
        V = v_in @ p[pre + "_wv"].T + p[pre + "_bv"]
        Q = Q.reshape(bsz, sq, NUM_HEADS, D_K).transpose(0, 2, 1, 3)
        K = K.reshape(bsz, sk, NUM_HEADS, D_K).transpose(0, 2, 1, 3)
        V = V.reshape(bsz, sk, NUM_HEADS, D_K).transpose(0, 2, 1, 3)
        scores = Q @ K.transpose(0, 1, 3, 2) / math.sqrt(D_K)
        scores = jnp.where(mask[None, None] == 0.0, NEG_INF, scores)
        attn = jax.nn.softmax(scores, axis=-1)
        out = (attn @ V).transpose(0, 2, 1, 3).reshape(bsz, sq, d)
        return out @ p[pre + "_wo"].T + p[pre + "_bo"]

    a = mha(x, x, x, "sa", tgt_mask)
    x = ln(x + a, p["ln1_g"], p["ln1_b"])
    c = mha(x, enc, enc, "ca", src_mask)
    x = ln(x + c, p["ln2_g"], p["ln2_b"])
    h = jax.nn.relu(x @ p["ff_w1"].T + p["ff_b1"])
    f = h @ p["ff_w2"].T + p["ff_b2"]
    return ln(x + f, p["ln3_g"], p["ln3_b"])


# ---------------------------------------------------------------------------
if __name__ == "__main__":
    key = jax.random.PRNGKey(0)
    k_x, k_enc, k_p = jax.random.split(key, 3)

    x = jax.random.normal(k_x, (B, S, D_MODEL), jnp.float32)
    enc_output = jax.random.normal(k_enc, (B, S_ENC, D_MODEL), jnp.float32)
    tgt_mask = jnp.tril(jnp.ones((S, S), jnp.float32))        # causal mask
    src_mask = jnp.ones((S, S_ENC), jnp.float32)              # no padding
    params = init_params(k_p)

    out = decoder_layer(x, enc_output, tgt_mask, src_mask, params)
    out = jax.block_until_ready(out)

    ref = decoder_layer_ref(x, enc_output, tgt_mask, src_mask, params)
    assert out.shape == (B, S, D_MODEL)
    assert jnp.allclose(out, ref, atol=1e-4, rtol=1e-4), "kernel/reference mismatch"

    print("KERNEL_OK")
</pallas_src>

<mosaic_0001>
module attributes {stable_mosaic.version = 11 : i64} {
  func.func @decoder_layer_kernel(%arg0: memref<2x8x32xf32, #tpu.memory_space<vmem>>, %arg1: memref<2x8x32xf32, #tpu.memory_space<vmem>>, %arg2: memref<8x8xf32, #tpu.memory_space<vmem>>, %arg3: memref<8x8xf32, #tpu.memory_space<vmem>>, %arg4: memref<32x96xf32, #tpu.memory_space<vmem>>, %arg5: memref<64x64xf32, #tpu.memory_space<vmem>>, %arg6: memref<160x32xf32, #tpu.memory_space<vmem>>, %arg7: memref<13x96xf32, #tpu.memory_space<vmem>>, %arg8: memref<2x8x32xf32, #tpu.memory_space<vmem>>) attributes {dimension_semantics = [], scalar_prefetch = 0 : i64, scratch_operands = 0 : i64, tpu.core_type = #tpu.core_type<tc>} {
    %c0 = arith.constant 0 : index
    %c0_0 = arith.constant 0 : index
    %0 = vector.load %arg4[%c0, %c0_0] : memref<32x96xf32, #tpu.memory_space<vmem>>, vector<32x96xf32>
    %c0_1 = arith.constant 0 : index
    %c0_2 = arith.constant 0 : index
    %1 = vector.load %arg5[%c0_1, %c0_2] : memref<64x64xf32, #tpu.memory_space<vmem>>, vector<32x64xf32>
    %c32 = arith.constant 32 : index
    %c0_3 = arith.constant 0 : index
    %2 = vector.load %arg5[%c32, %c0_3] : memref<64x64xf32, #tpu.memory_space<vmem>>, vector<32x64xf32>
    %c0_4 = arith.constant 0 : index
    %c0_5 = arith.constant 0 : index
    %3 = vector.load %arg6[%c0_4, %c0_5] : memref<160x32xf32, #tpu.memory_space<vmem>>, vector<32x32xf32>
    %c32_6 = arith.constant 32 : index
    %c0_7 = arith.constant 0 : index
    %4 = vector.load %arg6[%c32_6, %c0_7] : memref<160x32xf32, #tpu.memory_space<vmem>>, vector<32x32xf32>
    %c64 = arith.constant 64 : index
    %c0_8 = arith.constant 0 : index
    %5 = vector.load %arg6[%c64, %c0_8] : memref<160x32xf32, #tpu.memory_space<vmem>>, vector<32x32xf32>
    %c96 = arith.constant 96 : index
    %c0_9 = arith.constant 0 : index
    %6 = vector.load %arg6[%c96, %c0_9] : memref<160x32xf32, #tpu.memory_space<vmem>>, vector<64x32xf32>
    %c0_10 = arith.constant 0 : index
    %c0_11 = arith.constant 0 : index
    %7 = vector.load %arg7[%c0_10, %c0_11] : memref<13x96xf32, #tpu.memory_space<vmem>>, vector<1x96xf32>
    %c1 = arith.constant 1 : index
    %c0_12 = arith.constant 0 : index
    %8 = vector.load %arg7[%c1, %c0_12] : memref<13x96xf32, #tpu.memory_space<vmem>>, vector<1x32xf32>
    %c2 = arith.constant 2 : index
    %c0_13 = arith.constant 0 : index
    %9 = vector.load %arg7[%c2, %c0_13] : memref<13x96xf32, #tpu.memory_space<vmem>>, vector<1x64xf32>
    %c3 = arith.constant 3 : index
    %c0_14 = arith.constant 0 : index
    %10 = vector.load %arg7[%c3, %c0_14] : memref<13x96xf32, #tpu.memory_space<vmem>>, vector<1x32xf32>
    %c4 = arith.constant 4 : index
    %c0_15 = arith.constant 0 : index
    %11 = vector.load %arg7[%c4, %c0_15] : memref<13x96xf32, #tpu.memory_space<vmem>>, vector<1x32xf32>
    %c5 = arith.constant 5 : index
    %c0_16 = arith.constant 0 : index
    %12 = vector.load %arg7[%c5, %c0_16] : memref<13x96xf32, #tpu.memory_space<vmem>>, vector<1x64xf32>
    %c6 = arith.constant 6 : index
    %c0_17 = arith.constant 0 : index
    %13 = vector.load %arg7[%c6, %c0_17] : memref<13x96xf32, #tpu.memory_space<vmem>>, vector<1x32xf32>
    %c7 = arith.constant 7 : index
    %c0_18 = arith.constant 0 : index
    %14 = vector.load %arg7[%c7, %c0_18] : memref<13x96xf32, #tpu.memory_space<vmem>>, vector<1x32xf32>
    %c8 = arith.constant 8 : index
    %c0_19 = arith.constant 0 : index
    %15 = vector.load %arg7[%c8, %c0_19] : memref<13x96xf32, #tpu.memory_space<vmem>>, vector<1x32xf32>
    %c9 = arith.constant 9 : index
    %c0_20 = arith.constant 0 : index
    %16 = vector.load %arg7[%c9, %c0_20] : memref<13x96xf32, #tpu.memory_space<vmem>>, vector<1x32xf32>
    %c10 = arith.constant 10 : index
    %c0_21 = arith.constant 0 : index
    %17 = vector.load %arg7[%c10, %c0_21] : memref<13x96xf32, #tpu.memory_space<vmem>>, vector<1x32xf32>
    %c11 = arith.constant 11 : index
    %c0_22 = arith.constant 0 : index
    %18 = vector.load %arg7[%c11, %c0_22] : memref<13x96xf32, #tpu.memory_space<vmem>>, vector<1x32xf32>
    %c12 = arith.constant 12 : index
    %c0_23 = arith.constant 0 : index
    %19 = vector.load %arg7[%c12, %c0_23] : memref<13x96xf32, #tpu.memory_space<vmem>>, vector<1x32xf32>
    %c0_24 = arith.constant 0 : index
    %c0_25 = arith.constant 0 : index
    %c0_26 = arith.constant 0 : index
    %20 = vector.load %arg0[%c0_24, %c0_25, %c0_26] : memref<2x8x32xf32, #tpu.memory_space<vmem>>, vector<2x8x32xf32>
    %21 = vector.shape_cast %20 : vector<2x8x32xf32> to vector<16x32xf32>
    %c0_27 = arith.constant 0 : index
    %c0_28 = arith.constant 0 : index
    %c0_29 = arith.constant 0 : index
    %22 = vector.load %arg1[%c0_27, %c0_28, %c0_29] : memref<2x8x32xf32, #tpu.memory_space<vmem>>, vector<2x8x32xf32>
    %23 = vector.shape_cast %22 : vector<2x8x32xf32> to vector<16x32xf32>
    %cst = arith.constant dense<0.000000e+00> : vector<16x96xf32>
    %24 = tpu.matmul %21, %0, %cst {dimension_numbers = #tpu.dot_dimension_numbers<[1], [0], [0], [1], [0, 0, 1, 1], [], []>} : vector<16x32xf32>, vector<32x96xf32>, vector<16x96xf32> -> vector<16x96xf32>
    %25 = vector.broadcast %7 : vector<1x96xf32> to vector<16x96xf32>
    %26 = arith.addf %24, %25 : vector<16x96xf32>
    %27 = vector.extract_strided_slice %26 {offsets = [0, 0], sizes = [16, 32], strides = [1, 1]} : vector<16x96xf32> to vector<16x32xf32>
    %28 = vector.extract_strided_slice %26 {offsets = [0, 32], sizes = [16, 32], strides = [1, 1]} : vector<16x96xf32> to vector<16x32xf32>
    %29 = vector.extract_strided_slice %26 {offsets = [0, 64], sizes = [16, 32], strides = [1, 1]} : vector<16x96xf32> to vector<16x32xf32>
    %c0_30 = arith.constant 0 : index
    %c0_31 = arith.constant 0 : index
    %30 = vector.load %arg2[%c0_30, %c0_31] : memref<8x8xf32, #tpu.memory_space<vmem>>, vector<8x8xf32>
    %31 = vector.shape_cast %27 : vector<16x32xf32> to vector<2x8x32xf32>
    %32 = vector.shape_cast %28 : vector<16x32xf32> to vector<2x8x32xf32>
    %33 = vector.shape_cast %29 : vector<16x32xf32> to vector<2x8x32xf32>
    %cst_32 = arith.constant 0.000000e+00 : f32
    %34 = vector.broadcast %cst_32 : f32 to vector<8x8xf32>
    %35 = arith.cmpf oeq, %30, %34 : vector<8x8xf32>
    %cst_33 = arith.constant -1.000000e+09 : f32
    %cst_34 = arith.constant 0.000000e+00 : f32
    %36 = vector.broadcast %cst_33 : f32 to vector<8x8xf32>
    %37 = vector.broadcast %cst_34 : f32 to vector<8x8xf32>
    %38 = arith.select %35, %36, %37 : vector<8x8xi1>, vector<8x8xf32>
    %39 = vector.shape_cast %38 : vector<8x8xf32> to vector<1x8x8xf32>
    %40 = vector.shape_cast %39 : vector<1x8x8xf32> to vector<1x8x8xf32>
    %41 = vector.broadcast %40 : vector<1x8x8xf32> to vector<2x8x8xf32>
    %42 = vector.extract_strided_slice %31 {offsets = [0, 0, 0], sizes = [2, 8, 8], strides = [1, 1, 1]} : vector<2x8x32xf32> to vector<2x8x8xf32>
    %43 = vector.extract_strided_slice %32 {offsets = [0, 0, 0], sizes = [2, 8, 8], strides = [1, 1, 1]} : vector<2x8x32xf32> to vector<2x8x8xf32>
    "tpu.trace_start"() <{level = 10 : i32, message = "bqd,bkd->bqk"}> : () -> ()
    %cst_35 = arith.constant dense<0.000000e+00> : vector<2x8x8xf32>
    %44 = tpu.matmul %42, %43, %cst_35 {dimension_numbers = #tpu.dot_dimension_numbers<[2], [2], [1], [1], [0, 0, 0, 1, 1, 1], [0], [0]>} : vector<2x8x8xf32>, vector<2x8x8xf32>, vector<2x8x8xf32> -> vector<2x8x8xf32>
    "tpu.trace_stop"() : () -> ()
    %45 = arith.addf %44, %41 : vector<2x8x8xf32>
    %cst_36 = arith.constant dense<0xFF800000> : vector<2x8xf32>
    %46 = vector.multi_reduction <maximumf>, %45, %cst_36 [2] : vector<2x8x8xf32> to vector<2x8xf32>
    %47 = vector.shape_cast %46 : vector<2x8xf32> to vector<2x8x1xf32>
    %48 = vector.broadcast %47 : vector<2x8x1xf32> to vector<2x8x8xf32>
    %49 = arith.subf %45, %48 : vector<2x8x8xf32>
    %50 = math.exp %49 : vector<2x8x8xf32>
    %cst_37 = arith.constant dense<0.000000e+00> : vector<2x8xf32>
    %51 = vector.multi_reduction <add>, %50, %cst_37 [2] : vector<2x8x8xf32> to vector<2x8xf32>
    %52 = vector.shape_cast %51 : vector<2x8xf32> to vector<2x8x1xf32>
    %53 = tpu.reciprocal %52 : vector<2x8x1xf32> -> vector<2x8x1xf32>
    %54 = vector.broadcast %53 : vector<2x8x1xf32> to vector<2x8x8xf32>
    %55 = arith.mulf %50, %54 : vector<2x8x8xf32>
    %56 = vector.extract_strided_slice %33 {offsets = [0, 0, 0], sizes = [2, 8, 8], strides = [1, 1, 1]} : vector<2x8x32xf32> to vector<2x8x8xf32>
    "tpu.trace_start"() <{level = 10 : i32, message = "bqk,bkd->bqd"}> : () -> ()
    %cst_38 = arith.constant dense<0.000000e+00> : vector<2x8x8xf32>
    %57 = tpu.matmul %55, %56, %cst_38 {dimension_numbers = #tpu.dot_dimension_numbers<[2], [1], [1], [2], [0, 0, 0, 1, 1, 2], [0], [0]>} : vector<2x8x8xf32>, vector<2x8x8xf32>, vector<2x8x8xf32> -> vector<2x8x8xf32>
    "tpu.trace_stop"() : () -> ()
    %58 = vector.extract_strided_slice %31 {offsets = [0, 0, 8], sizes = [2, 8, 8], strides = [1, 1, 1]} : vector<2x8x32xf32> to vector<2x8x8xf32>
    %59 = vector.extract_strided_slice %32 {offsets = [0, 0, 8], sizes = [2, 8, 8], strides = [1, 1, 1]} : vector<2x8x32xf32> to vector<2x8x8xf32>
    "tpu.trace_start"() <{level = 10 : i32, message = "bqd,bkd->bqk"}> : () -> ()
    %cst_39 = arith.constant dense<0.000000e+00> : vector<2x8x8xf32>
    %60 = tpu.matmul %58, %59, %cst_39 {dimension_numbers = #tpu.dot_dimension_numbers<[2], [2], [1], [1], [0, 0, 0, 1, 1, 1], [0], [0]>} : vector<2x8x8xf32>, vector<2x8x8xf32>, vector<2x8x8xf32> -> vector<2x8x8xf32>
    "tpu.trace_stop"() : () -> ()
    %61 = arith.addf %60, %41 : vector<2x8x8xf32>
    %cst_40 = arith.constant dense<0xFF800000> : vector<2x8xf32>
    %62 = vector.multi_reduction <maximumf>, %61, %cst_40 [2] : vector<2x8x8xf32> to vector<2x8xf32>
    %63 = vector.shape_cast %62 : vector<2x8xf32> to vector<2x8x1xf32>
    %64 = vector.broadcast %63 : vector<2x8x1xf32> to vector<2x8x8xf32>
    %65 = arith.subf %61, %64 : vector<2x8x8xf32>
    %66 = math.exp %65 : vector<2x8x8xf32>
    %cst_41 = arith.constant dense<0.000000e+00> : vector<2x8xf32>
    %67 = vector.multi_reduction <add>, %66, %cst_41 [2] : vector<2x8x8xf32> to vector<2x8xf32>
    %68 = vector.shape_cast %67 : vector<2x8xf32> to vector<2x8x1xf32>
    %69 = tpu.reciprocal %68 : vector<2x8x1xf32> -> vector<2x8x1xf32>
    %70 = vector.broadcast %69 : vector<2x8x1xf32> to vector<2x8x8xf32>
    %71 = arith.mulf %66, %70 : vector<2x8x8xf32>
    %72 = vector.extract_strided_slice %33 {offsets = [0, 0, 8], sizes = [2, 8, 8], strides = [1, 1, 1]} : vector<2x8x32xf32> to vector<2x8x8xf32>
    "tpu.trace_start"() <{level = 10 : i32, message = "bqk,bkd->bqd"}> : () -> ()
    %cst_42 = arith.constant dense<0.000000e+00> : vector<2x8x8xf32>
    %73 = tpu.matmul %71, %72, %cst_42 {dimension_numbers = #tpu.dot_dimension_numbers<[2], [1], [1], [2], [0, 0, 0, 1, 1, 2], [0], [0]>} : vector<2x8x8xf32>, vector<2x8x8xf32>, vector<2x8x8xf32> -> vector<2x8x8xf32>
    "tpu.trace_stop"() : () -> ()
    %74 = vector.extract_strided_slice %31 {offsets = [0, 0, 16], sizes = [2, 8, 8], strides = [1, 1, 1]} : vector<2x8x32xf32> to vector<2x8x8xf32>
    %75 = vector.extract_strided_slice %32 {offsets = [0, 0, 16], sizes = [2, 8, 8], strides = [1, 1, 1]} : vector<2x8x32xf32> to vector<2x8x8xf32>
    "tpu.trace_start"() <{level = 10 : i32, message = "bqd,bkd->bqk"}> : () -> ()
    %cst_43 = arith.constant dense<0.000000e+00> : vector<2x8x8xf32>
    %76 = tpu.matmul %74, %75, %cst_43 {dimension_numbers = #tpu.dot_dimension_numbers<[2], [2], [1], [1], [0, 0, 0, 1, 1, 1], [0], [0]>} : vector<2x8x8xf32>, vector<2x8x8xf32>, vector<2x8x8xf32> -> vector<2x8x8xf32>
    "tpu.trace_stop"() : () -> ()
    %77 = arith.addf %76, %41 : vector<2x8x8xf32>
    %cst_44 = arith.constant dense<0xFF800000> : vector<2x8xf32>
    %78 = vector.multi_reduction <maximumf>, %77, %cst_44 [2] : vector<2x8x8xf32> to vector<2x8xf32>
    %79 = vector.shape_cast %78 : vector<2x8xf32> to vector<2x8x1xf32>
    %80 = vector.broadcast %79 : vector<2x8x1xf32> to vector<2x8x8xf32>
    %81 = arith.subf %77, %80 : vector<2x8x8xf32>
    %82 = math.exp %81 : vector<2x8x8xf32>
    %cst_45 = arith.constant dense<0.000000e+00> : vector<2x8xf32>
    %83 = vector.multi_reduction <add>, %82, %cst_45 [2] : vector<2x8x8xf32> to vector<2x8xf32>
    %84 = vector.shape_cast %83 : vector<2x8xf32> to vector<2x8x1xf32>
    %85 = tpu.reciprocal %84 : vector<2x8x1xf32> -> vector<2x8x1xf32>
    %86 = vector.broadcast %85 : vector<2x8x1xf32> to vector<2x8x8xf32>
    %87 = arith.mulf %82, %86 : vector<2x8x8xf32>
    %88 = vector.extract_strided_slice %33 {offsets = [0, 0, 16], sizes = [2, 8, 8], strides = [1, 1, 1]} : vector<2x8x32xf32> to vector<2x8x8xf32>
    "tpu.trace_start"() <{level = 10 : i32, message = "bqk,bkd->bqd"}> : () -> ()
    %cst_46 = arith.constant dense<0.000000e+00> : vector<2x8x8xf32>
    %89 = tpu.matmul %87, %88, %cst_46 {dimension_numbers = #tpu.dot_dimension_numbers<[2], [1], [1], [2], [0, 0, 0, 1, 1, 2], [0], [0]>} : vector<2x8x8xf32>, vector<2x8x8xf32>, vector<2x8x8xf32> -> vector<2x8x8xf32>
    "tpu.trace_stop"() : () -> ()
    %90 = vector.extract_strided_slice %31 {offsets = [0, 0, 24], sizes = [2, 8, 8], strides = [1, 1, 1]} : vector<2x8x32xf32> to vector<2x8x8xf32>
    %91 = vector.extract_strided_slice %32 {offsets = [0, 0, 24], sizes = [2, 8, 8], strides = [1, 1, 1]} : vector<2x8x32xf32> to vector<2x8x8xf32>
    "tpu.trace_start"() <{level = 10 : i32, message = "bqd,bkd->bqk"}> : () -> ()
    %cst_47 = arith.constant dense<0.000000e+00> : vector<2x8x8xf32>
    %92 = tpu.matmul %90, %91, %cst_47 {dimension_numbers = #tpu.dot_dimension_numbers<[2], [2], [1], [1], [0, 0, 0, 1, 1, 1], [0], [0]>} : vector<2x8x8xf32>, vector<2x8x8xf32>, vector<2x8x8xf32> -> vector<2x8x8xf32>
    "tpu.trace_stop"() : () -> ()
    %93 = arith.addf %92, %41 : vector<2x8x8xf32>
    %cst_48 = arith.constant dense<0xFF800000> : vector<2x8xf32>
    %94 = vector.multi_reduction <maximumf>, %93, %cst_48 [2] : vector<2x8x8xf32> to vector<2x8xf32>
    %95 = vector.shape_cast %94 : vector<2x8xf32> to vector<2x8x1xf32>
    %96 = vector.broadcast %95 : vector<2x8x1xf32> to vector<2x8x8xf32>
    %97 = arith.subf %93, %96 : vector<2x8x8xf32>
    %98 = math.exp %97 : vector<2x8x8xf32>
    %cst_49 = arith.constant dense<0.000000e+00> : vector<2x8xf32>
    %99 = vector.multi_reduction <add>, %98, %cst_49 [2] : vector<2x8x8xf32> to vector<2x8xf32>
    %100 = vector.shape_cast %99 : vector<2x8xf32> to vector<2x8x1xf32>
    %101 = tpu.reciprocal %100 : vector<2x8x1xf32> -> vector<2x8x1xf32>
    %102 = vector.broadcast %101 : vector<2x8x1xf32> to vector<2x8x8xf32>
    %103 = arith.mulf %98, %102 : vector<2x8x8xf32>
    %104 = vector.extract_strided_slice %33 {offsets = [0, 0, 24], sizes = [2, 8, 8], strides = [1, 1, 1]} : vector<2x8x32xf32> to vector<2x8x8xf32>
    "tpu.trace_start"() <{level = 10 : i32, message = "bqk,bkd->bqd"}> : () -> ()
    %cst_50 = arith.constant dense<0.000000e+00> : vector<2x8x8xf32>
    %105 = tpu.matmul %103, %104, %cst_50 {dimension_numbers = #tpu.dot_dimension_numbers<[2], [1], [1], [2], [0, 0, 0, 1, 1, 2], [0], [0]>} : vector<2x8x8xf32>, vector<2x8x8xf32>, vector<2x8x8xf32> -> vector<2x8x8xf32>
    "tpu.trace_stop"() : () -> ()
    %106 = tpu.concatenate %57, %73, %89, %105 in 2 : vector<2x8x8xf32>, vector<2x8x8xf32>, vector<2x8x8xf32>, vector<2x8x8xf32> -> vector<2x8x32xf32>
    %107 = vector.shape_cast %106 : vector<2x8x32xf32> to vector<16x32xf32>
    %cst_51 = arith.constant dense<0.000000e+00> : vector<16x32xf32>
    %108 = tpu.matmul %107, %4, %cst_51 {dimension_numbers = #tpu.dot_dimension_numbers<[1], [0], [0], [1], [0, 0, 1, 1], [], []>} : vector<16x32xf32>, vector<32x32xf32>, vector<16x32xf32> -> vector<16x32xf32>
    %109 = vector.broadcast %10 : vector<1x32xf32> to vector<16x32xf32>
    %110 = arith.addf %108, %109 : vector<16x32xf32>
    %111 = arith.addf %21, %110 : vector<16x32xf32>
    %cst_52 = arith.constant dense<0.000000e+00> : vector<16xf32>
    %112 = vector.multi_reduction <add>, %111, %cst_52 [1] : vector<16x32xf32> to vector<16xf32>
    %113 = vector.shape_cast %112 : vector<16xf32> to vector<16x1xf32>
    %cst_53 = arith.constant 3.200000e+01 : f32
    %114 = vector.broadcast %cst_53 : f32 to vector<16x1xf32>
    %115 = arith.divf %113, %114 : vector<16x1xf32>
    %116 = vector.broadcast %115 : vector<16x1xf32> to vector<16x32xf32>
    %117 = arith.subf %111, %116 : vector<16x32xf32>
    %118 = arith.mulf %117, %117 : vector<16x32xf32>
    %cst_54 = arith.constant dense<0.000000e+00> : vector<16xf32>
    %119 = vector.multi_reduction <add>, %118, %cst_54 [1] : vector<16x32xf32> to vector<16xf32>
    %120 = vector.shape_cast %119 : vector<16xf32> to vector<16x1xf32>
    %cst_55 = arith.constant 3.200000e+01 : f32
    %121 = vector.broadcast %cst_55 : f32 to vector<16x1xf32>
    %122 = arith.divf %120, %121 : vector<16x1xf32>
    %123 = vector.broadcast %115 : vector<16x1xf32> to vector<16x32xf32>
    %124 = arith.subf %111, %123 : vector<16x32xf32>
    %cst_56 = arith.constant 9.99999974E-6 : f32
    %125 = vector.broadcast %cst_56 : f32 to vector<16x1xf32>
    %126 = arith.addf %122, %125 : vector<16x1xf32>
    %127 = math.rsqrt %126 : vector<16x1xf32>
    %128 = vector.broadcast %127 : vector<16x1xf32> to vector<16x32xf32>
    %129 = arith.mulf %124, %128 : vector<16x32xf32>
    %130 = vector.broadcast %14 : vector<1x32xf32> to vector<16x32xf32>
    %131 = arith.mulf %129, %130 : vector<16x32xf32>
    %132 = vector.broadcast %15 : vector<1x32xf32> to vector<16x32xf32>
    %133 = arith.addf %131, %132 : vector<16x32xf32>
    %cst_57 = arith.constant dense<0.000000e+00> : vector<16x32xf32>
    %134 = tpu.matmul %133, %3, %cst_57 {dimension_numbers = #tpu.dot_dimension_numbers<[1], [0], [0], [1], [0, 0, 1, 1], [], []>} : vector<16x32xf32>, vector<32x32xf32>, vector<16x32xf32> -> vector<16x32xf32>
    %135 = vector.broadcast %8 : vector<1x32xf32> to vector<16x32xf32>
    %136 = arith.addf %134, %135 : vector<16x32xf32>
    %cst_58 = arith.constant dense<0.000000e+00> : vector<16x64xf32>
    %137 = tpu.matmul %23, %1, %cst_58 {dimension_numbers = #tpu.dot_dimension_numbers<[1], [0], [0], [1], [0, 0, 1, 1], [], []>} : vector<16x32xf32>, vector<32x64xf32>, vector<16x64xf32> -> vector<16x64xf32>
    %138 = vector.broadcast %9 : vector<1x64xf32> to vector<16x64xf32>
    %139 = arith.addf %137, %138 : vector<16x64xf32>
    %140 = vector.extract_strided_slice %139 {offsets = [0, 0], sizes = [16, 32], strides = [1, 1]} : vector<16x64xf32> to vector<16x32xf32>
    %141 = vector.extract_strided_slice %139 {offsets = [0, 32], sizes = [16, 32], strides = [1, 1]} : vector<16x64xf32> to vector<16x32xf32>
    %c0_59 = arith.constant 0 : index
    %c0_60 = arith.constant 0 : index
    %142 = vector.load %arg3[%c0_59, %c0_60] : memref<8x8xf32, #tpu.memory_space<vmem>>, vector<8x8xf32>
    %143 = vector.shape_cast %136 : vector<16x32xf32> to vector<2x8x32xf32>
    %144 = vector.shape_cast %140 : vector<16x32xf32> to vector<2x8x32xf32>
    %145 = vector.shape_cast %141 : vector<16x32xf32> to vector<2x8x32xf32>
    %cst_61 = arith.constant 0.000000e+00 : f32
    %146 = vector.broadcast %cst_61 : f32 to vector<8x8xf32>
    %147 = arith.cmpf oeq, %142, %146 : vector<8x8xf32>
    %cst_62 = arith.constant -1.000000e+09 : f32
    %cst_63 = arith.constant 0.000000e+00 : f32
    %148 = vector.broadcast %cst_62 : f32 to vector<8x8xf32>
    %149 = vector.broadcast %cst_63 : f32 to vector<8x8xf32>
    %150 = arith.select %147, %148, %149 : vector<8x8xi1>, vector<8x8xf32>
    %151 = vector.shape_cast %150 : vector<8x8xf32> to vector<1x8x8xf32>
    %152 = vector.shape_cast %151 : vector<1x8x8xf32> to vector<1x8x8xf32>
    %153 = vector.broadcast %152 : vector<1x8x8xf32> to vector<2x8x8xf32>
    %154 = vector.extract_strided_slice %143 {offsets = [0, 0, 0], sizes = [2, 8, 8], strides = [1, 1, 1]} : vector<2x8x32xf32> to vector<2x8x8xf32>
    %155 = vector.extract_strided_slice %144 {offsets = [0, 0, 0], sizes = [2, 8, 8], strides = [1, 1, 1]} : vector<2x8x32xf32> to vector<2x8x8xf32>
    "tpu.trace_start"() <{level = 10 : i32, message = "bqd,bkd->bqk"}> : () -> ()
    %cst_64 = arith.constant dense<0.000000e+00> : vector<2x8x8xf32>
    %156 = tpu.matmul %154, %155, %cst_64 {dimension_numbers = #tpu.dot_dimension_numbers<[2], [2], [1], [1], [0, 0, 0, 1, 1, 1], [0], [0]>} : vector<2x8x8xf32>, vector<2x8x8xf32>, vector<2x8x8xf32> -> vector<2x8x8xf32>
    "tpu.trace_stop"() : () -> ()
    %157 = arith.addf %156, %153 : vector<2x8x8xf32>
    %cst_65 = arith.constant dense<0xFF800000> : vector<2x8xf32>
    %158 = vector.multi_reduction <maximumf>, %157, %cst_65 [2] : vector<2x8x8xf32> to vector<2x8xf32>
    %159 = vector.shape_cast %158 : vector<2x8xf32> to vector<2x8x1xf32>
    %160 = vector.broadcast %159 : vector<2x8x1xf32> to vector<2x8x8xf32>
    %161 = arith.subf %157, %160 : vector<2x8x8xf32>
    %162 = math.exp %161 : vector<2x8x8xf32>
    %cst_66 = arith.constant dense<0.000000e+00> : vector<2x8xf32>
    %163 = vector.multi_reduction <add>, %162, %cst_66 [2] : vector<2x8x8xf32> to vector<2x8xf32>
    %164 = vector.shape_cast %163 : vector<2x8xf32> to vector<2x8x1xf32>
    %165 = tpu.reciprocal %164 : vector<2x8x1xf32> -> vector<2x8x1xf32>
    %166 = vector.broadcast %165 : vector<2x8x1xf32> to vector<2x8x8xf32>
    %167 = arith.mulf %162, %166 : vector<2x8x8xf32>
    %168 = vector.extract_strided_slice %145 {offsets = [0, 0, 0], sizes = [2, 8, 8], strides = [1, 1, 1]} : vector<2x8x32xf32> to vector<2x8x8xf32>
    "tpu.trace_start"() <{level = 10 : i32, message = "bqk,bkd->bqd"}> : () -> ()
    %cst_67 = arith.constant dense<0.000000e+00> : vector<2x8x8xf32>
    %169 = tpu.matmul %167, %168, %cst_67 {dimension_numbers = #tpu.dot_dimension_numbers<[2], [1], [1], [2], [0, 0, 0, 1, 1, 2], [0], [0]>} : vector<2x8x8xf32>, vector<2x8x8xf32>, vector<2x8x8xf32> -> vector<2x8x8xf32>
    "tpu.trace_stop"() : () -> ()
    %170 = vector.extract_strided_slice %143 {offsets = [0, 0, 8], sizes = [2, 8, 8], strides = [1, 1, 1]} : vector<2x8x32xf32> to vector<2x8x8xf32>
    %171 = vector.extract_strided_slice %144 {offsets = [0, 0, 8], sizes = [2, 8, 8], strides = [1, 1, 1]} : vector<2x8x32xf32> to vector<2x8x8xf32>
    "tpu.trace_start"() <{level = 10 : i32, message = "bqd,bkd->bqk"}> : () -> ()
    %cst_68 = arith.constant dense<0.000000e+00> : vector<2x8x8xf32>
    %172 = tpu.matmul %170, %171, %cst_68 {dimension_numbers = #tpu.dot_dimension_numbers<[2], [2], [1], [1], [0, 0, 0, 1, 1, 1], [0], [0]>} : vector<2x8x8xf32>, vector<2x8x8xf32>, vector<2x8x8xf32> -> vector<2x8x8xf32>
    "tpu.trace_stop"() : () -> ()
    %173 = arith.addf %172, %153 : vector<2x8x8xf32>
    %cst_69 = arith.constant dense<0xFF800000> : vector<2x8xf32>
    %174 = vector.multi_reduction <maximumf>, %173, %cst_69 [2] : vector<2x8x8xf32> to vector<2x8xf32>
    %175 = vector.shape_cast %174 : vector<2x8xf32> to vector<2x8x1xf32>
    %176 = vector.broadcast %175 : vector<2x8x1xf32> to vector<2x8x8xf32>
    %177 = arith.subf %173, %176 : vector<2x8x8xf32>
    %178 = math.exp %177 : vector<2x8x8xf32>
    %cst_70 = arith.constant dense<0.000000e+00> : vector<2x8xf32>
    %179 = vector.multi_reduction <add>, %178, %cst_70 [2] : vector<2x8x8xf32> to vector<2x8xf32>
    %180 = vector.shape_cast %179 : vector<2x8xf32> to vector<2x8x1xf32>
    %181 = tpu.reciprocal %180 : vector<2x8x1xf32> -> vector<2x8x1xf32>
    %182 = vector.broadcast %181 : vector<2x8x1xf32> to vector<2x8x8xf32>
    %183 = arith.mulf %178, %182 : vector<2x8x8xf32>
    %184 = vector.extract_strided_slice %145 {offsets = [0, 0, 8], sizes = [2, 8, 8], strides = [1, 1, 1]} : vector<2x8x32xf32> to vector<2x8x8xf32>
    "tpu.trace_start"() <{level = 10 : i32, message = "bqk,bkd->bqd"}> : () -> ()
    %cst_71 = arith.constant dense<0.000000e+00> : vector<2x8x8xf32>
    %185 = tpu.matmul %183, %184, %cst_71 {dimension_numbers = #tpu.dot_dimension_numbers<[2], [1], [1], [2], [0, 0, 0, 1, 1, 2], [0], [0]>} : vector<2x8x8xf32>, vector<2x8x8xf32>, vector<2x8x8xf32> -> vector<2x8x8xf32>
    "tpu.trace_stop"() : () -> ()
    %186 = vector.extract_strided_slice %143 {offsets = [0, 0, 16], sizes = [2, 8, 8], strides = [1, 1, 1]} : vector<2x8x32xf32> to vector<2x8x8xf32>
    %187 = vector.extract_strided_slice %144 {offsets = [0, 0, 16], sizes = [2, 8, 8], strides = [1, 1, 1]} : vector<2x8x32xf32> to vector<2x8x8xf32>
    "tpu.trace_start"() <{level = 10 : i32, message = "bqd,bkd->bqk"}> : () -> ()
    %cst_72 = arith.constant dense<0.000000e+00> : vector<2x8x8xf32>
    %188 = tpu.matmul %186, %187, %cst_72 {dimension_numbers = #tpu.dot_dimension_numbers<[2], [2], [1], [1], [0, 0, 0, 1, 1, 1], [0], [0]>} : vector<2x8x8xf32>, vector<2x8x8xf32>, vector<2x8x8xf32> -> vector<2x8x8xf32>
    "tpu.trace_stop"() : () -> ()
    %189 = arith.addf %188, %153 : vector<2x8x8xf32>
    %cst_73 = arith.constant dense<0xFF800000> : vector<2x8xf32>
    %190 = vector.multi_reduction <maximumf>, %189, %cst_73 [2] : vector<2x8x8xf32> to vector<2x8xf32>
    %191 = vector.shape_cast %190 : vector<2x8xf32> to vector<2x8x1xf32>
    %192 = vector.broadcast %191 : vector<2x8x1xf32> to vector<2x8x8xf32>
    %193 = arith.subf %189, %192 : vector<2x8x8xf32>
    %194 = math.exp %193 : vector<2x8x8xf32>
    %cst_74 = arith.constant dense<0.000000e+00> : vector<2x8xf32>
    %195 = vector.multi_reduction <add>, %194, %cst_74 [2] : vector<2x8x8xf32> to vector<2x8xf32>
    %196 = vector.shape_cast %195 : vector<2x8xf32> to vector<2x8x1xf32>
    %197 = tpu.reciprocal %196 : vector<2x8x1xf32> -> vector<2x8x1xf32>
    %198 = vector.broadcast %197 : vector<2x8x1xf32> to vector<2x8x8xf32>
    %199 = arith.mulf %194, %198 : vector<2x8x8xf32>
    %200 = vector.extract_strided_slice %145 {offsets = [0, 0, 16], sizes = [2, 8, 8], strides = [1, 1, 1]} : vector<2x8x32xf32> to vector<2x8x8xf32>
    "tpu.trace_start"() <{level = 10 : i32, message = "bqk,bkd->bqd"}> : () -> ()
    %cst_75 = arith.constant dense<0.000000e+00> : vector<2x8x8xf32>
    %201 = tpu.matmul %199, %200, %cst_75 {dimension_numbers = #tpu.dot_dimension_numbers<[2], [1], [1], [2], [0, 0, 0, 1, 1, 2], [0], [0]>} : vector<2x8x8xf32>, vector<2x8x8xf32>, vector<2x8x8xf32> -> vector<2x8x8xf32>
    "tpu.trace_stop"() : () -> ()
    %202 = vector.extract_strided_slice %143 {offsets = [0, 0, 24], sizes = [2, 8, 8], strides = [1, 1, 1]} : vector<2x8x32xf32> to vector<2x8x8xf32>
    %203 = vector.extract_strided_slice %144 {offsets = [0, 0, 24], sizes = [2, 8, 8], strides = [1, 1, 1]} : vector<2x8x32xf32> to vector<2x8x8xf32>
    "tpu.trace_start"() <{level = 10 : i32, message = "bqd,bkd->bqk"}> : () -> ()
    %cst_76 = arith.constant dense<0.000000e+00> : vector<2x8x8xf32>
    %204 = tpu.matmul %202, %203, %cst_76 {dimension_numbers = #tpu.dot_dimension_numbers<[2], [2], [1], [1], [0, 0, 0, 1, 1, 1], [0], [0]>} : vector<2x8x8xf32>, vector<2x8x8xf32>, vector<2x8x8xf32> -> vector<2x8x8xf32>
    "tpu.trace_stop"() : () -> ()
    %205 = arith.addf %204, %153 : vector<2x8x8xf32>
    %cst_77 = arith.constant dense<0xFF800000> : vector<2x8xf32>
    %206 = vector.multi_reduction <maximumf>, %205, %cst_77 [2] : vector<2x8x8xf32> to vector<2x8xf32>
    %207 = vector.shape_cast %206 : vector<2x8xf32> to vector<2x8x1xf32>
    %208 = vector.broadcast %207 : vector<2x8x1xf32> to vector<2x8x8xf32>
    %209 = arith.subf %205, %208 : vector<2x8x8xf32>
    %210 = math.exp %209 : vector<2x8x8xf32>
    %cst_78 = arith.constant dense<0.000000e+00> : vector<2x8xf32>
    %211 = vector.multi_reduction <add>, %210, %cst_78 [2] : vector<2x8x8xf32> to vector<2x8xf32>
    %212 = vector.shape_cast %211 : vector<2x8xf32> to vector<2x8x1xf32>
    %213 = tpu.reciprocal %212 : vector<2x8x1xf32> -> vector<2x8x1xf32>
    %214 = vector.broadcast %213 : vector<2x8x1xf32> to vector<2x8x8xf32>
    %215 = arith.mulf %210, %214 : vector<2x8x8xf32>
    %216 = vector.extract_strided_slice %145 {offsets = [0, 0, 24], sizes = [2, 8, 8], strides = [1, 1, 1]} : vector<2x8x32xf32> to vector<2x8x8xf32>
    "tpu.trace_start"() <{level = 10 : i32, message = "bqk,bkd->bqd"}> : () -> ()
    %cst_79 = arith.constant dense<0.000000e+00> : vector<2x8x8xf32>
    %217 = tpu.matmul %215, %216, %cst_79 {dimension_numbers = #tpu.dot_dimension_numbers<[2], [1], [1], [2], [0, 0, 0, 1, 1, 2], [0], [0]>} : vector<2x8x8xf32>, vector<2x8x8xf32>, vector<2x8x8xf32> -> vector<2x8x8xf32>
    "tpu.trace_stop"() : () -> ()
    %218 = tpu.concatenate %169, %185, %201, %217 in 2 : vector<2x8x8xf32>, vector<2x8x8xf32>, vector<2x8x8xf32>, vector<2x8x8xf32> -> vector<2x8x32xf32>
    %219 = vector.shape_cast %218 : vector<2x8x32xf32> to vector<16x32xf32>
    %cst_80 = arith.constant dense<0.000000e+00> : vector<16x32xf32>
    %220 = tpu.matmul %219, %5, %cst_80 {dimension_numbers = #tpu.dot_dimension_numbers<[1], [0], [0], [1], [0, 0, 1, 1], [], []>} : vector<16x32xf32>, vector<32x32xf32>, vector<16x32xf32> -> vector<16x32xf32>
    %221 = vector.broadcast %11 : vector<1x32xf32> to vector<16x32xf32>
    %222 = arith.addf %220, %221 : vector<16x32xf32>
    %223 = arith.addf %133, %222 : vector<16x32xf32>
    %cst_81 = arith.constant dense<0.000000e+00> : vector<16xf32>
    %224 = vector.multi_reduction <add>, %223, %cst_81 [1] : vector<16x32xf32> to vector<16xf32>
    %225 = vector.shape_cast %224 : vector<16xf32> to vector<16x1xf32>
    %cst_82 = arith.constant 3.200000e+01 : f32
    %226 = vector.broadcast %cst_82 : f32 to vector<16x1xf32>
    %227 = arith.divf %225, %226 : vector<16x1xf32>
    %228 = vector.broadcast %227 : vector<16x1xf32> to vector<16x32xf32>
    %229 = arith.subf %223, %228 : vector<16x32xf32>
    %230 = arith.mulf %229, %229 : vector<16x32xf32>
    %cst_83 = arith.constant dense<0.000000e+00> : vector<16xf32>
    %231 = vector.multi_reduction <add>, %230, %cst_83 [1] : vector<16x32xf32> to vector<16xf32>
    %232 = vector.shape_cast %231 : vector<16xf32> to vector<16x1xf32>
    %cst_84 = arith.constant 3.200000e+01 : f32
    %233 = vector.broadcast %cst_84 : f32 to vector<16x1xf32>
    %234 = arith.divf %232, %233 : vector<16x1xf32>
    %235 = vector.broadcast %227 : vector<16x1xf32> to vector<16x32xf32>
    %236 = arith.subf %223, %235 : vector<16x32xf32>
    %cst_85 = arith.constant 9.99999974E-6 : f32
    %237 = vector.broadcast %cst_85 : f32 to vector<16x1xf32>
    %238 = arith.addf %234, %237 : vector<16x1xf32>
    %239 = math.rsqrt %238 : vector<16x1xf32>
    %240 = vector.broadcast %239 : vector<16x1xf32> to vector<16x32xf32>
    %241 = arith.mulf %236, %240 : vector<16x32xf32>
    %242 = vector.broadcast %16 : vector<1x32xf32> to vector<16x32xf32>
    %243 = arith.mulf %241, %242 : vector<16x32xf32>
    %244 = vector.broadcast %17 : vector<1x32xf32> to vector<16x32xf32>
    %245 = arith.addf %243, %244 : vector<16x32xf32>
    %cst_86 = arith.constant dense<0.000000e+00> : vector<16x64xf32>
    %246 = tpu.matmul %245, %2, %cst_86 {dimension_numbers = #tpu.dot_dimension_numbers<[1], [0], [0], [1], [0, 0, 1, 1], [], []>} : vector<16x32xf32>, vector<32x64xf32>, vector<16x64xf32> -> vector<16x64xf32>
    %247 = vector.broadcast %12 : vector<1x64xf32> to vector<16x64xf32>
    %248 = arith.addf %246, %247 : vector<16x64xf32>
    %cst_87 = arith.constant 0.000000e+00 : f32
    %249 = vector.broadcast %cst_87 : f32 to vector<16x64xf32>
    %250 = arith.maximumf %248, %249 : vector<16x64xf32>
    %cst_88 = arith.constant dense<0.000000e+00> : vector<16x32xf32>
    %251 = tpu.matmul %250, %6, %cst_88 {dimension_numbers = #tpu.dot_dimension_numbers<[1], [0], [0], [1], [0, 0, 1, 1], [], []>} : vector<16x64xf32>, vector<64x32xf32>, vector<16x32xf32> -> vector<16x32xf32>
    %252 = vector.broadcast %13 : vector<1x32xf32> to vector<16x32xf32>
    %253 = arith.addf %251, %252 : vector<16x32xf32>
    %254 = arith.addf %245, %253 : vector<16x32xf32>
    %cst_89 = arith.constant dense<0.000000e+00> : vector<16xf32>
    %255 = vector.multi_reduction <add>, %254, %cst_89 [1] : vector<16x32xf32> to vector<16xf32>
    %256 = vector.shape_cast %255 : vector<16xf32> to vector<16x1xf32>
    %cst_90 = arith.constant 3.200000e+01 : f32
    %257 = vector.broadcast %cst_90 : f32 to vector<16x1xf32>
    %258 = arith.divf %256, %257 : vector<16x1xf32>
    %259 = vector.broadcast %258 : vector<16x1xf32> to vector<16x32xf32>
    %260 = arith.subf %254, %259 : vector<16x32xf32>
    %261 = arith.mulf %260, %260 : vector<16x32xf32>
    %cst_91 = arith.constant dense<0.000000e+00> : vector<16xf32>
    %262 = vector.multi_reduction <add>, %261, %cst_91 [1] : vector<16x32xf32> to vector<16xf32>
    %263 = vector.shape_cast %262 : vector<16xf32> to vector<16x1xf32>
    %cst_92 = arith.constant 3.200000e+01 : f32
    %264 = vector.broadcast %cst_92 : f32 to vector<16x1xf32>
    %265 = arith.divf %263, %264 : vector<16x1xf32>
    %266 = vector.broadcast %258 : vector<16x1xf32> to vector<16x32xf32>
    %267 = arith.subf %254, %266 : vector<16x32xf32>
    %cst_93 = arith.constant 9.99999974E-6 : f32
    %268 = vector.broadcast %cst_93 : f32 to vector<16x1xf32>
    %269 = arith.addf %265, %268 : vector<16x1xf32>
    %270 = math.rsqrt %269 : vector<16x1xf32>
    %271 = vector.broadcast %270 : vector<16x1xf32> to vector<16x32xf32>
    %272 = arith.mulf %267, %271 : vector<16x32xf32>
    %273 = vector.broadcast %18 : vector<1x32xf32> to vector<16x32xf32>
    %274 = arith.mulf %272, %273 : vector<16x32xf32>
    %275 = vector.broadcast %19 : vector<1x32xf32> to vector<16x32xf32>
    %276 = arith.addf %274, %275 : vector<16x32xf32>
    %277 = vector.shape_cast %276 : vector<16x32xf32> to vector<2x8x32xf32>
    %c0_94 = arith.constant 0 : index
    %c0_95 = arith.constant 0 : index
    %c0_96 = arith.constant 0 : index
    %278 = vector.load %arg8[%c0_94, %c0_95, %c0_96] : memref<2x8x32xf32, #tpu.memory_space<vmem>>, vector<2x8x32xf32>
    tpu.vector_store %arg8[%c0_94, %c0_95, %c0_96], %277 {strides = array<i32>} : memref<2x8x32xf32, #tpu.memory_space<vmem>>, vector<2x8x32xf32>,
    return
  }
}

</mosaic_0001>

<bundles_post_ra>
// kernel: tpu_custom_call.1
= control target key start
LH: loop header
LB: loop body
LE: loop exit
PB: predicated region body
PF: predicated region fallthrough
CT: control target
= control target key end

     0   :  { %vm83_vm0 = vcmask 261120   ;;  %s4668_s0 = inlined_call_operand.vmem [shape: f32[2,8,32], index: 0, kind: input, shape index: {}]   ;;  %s4669_s1 = inlined_call_operand.vmem [shape: f32[2,8,32], index: 1, kind: input, shape index: {}]   ;;  %s4670_s2 = inlined_call_operand.vmem [shape: f32[8,8], index: 2, kind: input, shape index: {}]   ;;  %s4671_s3 = inlined_call_operand.vmem [shape: f32[8,8], index: 3, kind: input, shape index: {}]   ;;  %s4672_s4 = inlined_call_operand.vmem [shape: f32[32,96], index: 4, kind: input, shape index: {}]   ;;  %s4673_s5 = inlined_call_operand.vmem [shape: f32[64,64], index: 5, kind: input, shape index: {}]   ;;  %s4674_s6 = inlined_call_operand.vmem [shape: f32[160,32], index: 6, kind: input, shape index: {}]   ;;  %s4675_s7 = inlined_call_operand.vmem [shape: f32[13,96], index: 7, kind: input, shape index: {}]   ;;  %s4676_s8 = inlined_call_operand.hbm [shape: f32[2,8,32], index: 8, kind: output, shape index: {}]  }
   0x1   :  { %v33_v0 = vld [vmem:[%s4672_s4 + $0x18] sm:$0xff]  ;;  %v32_v1 = vld [vmem:[%s4672_s4 + $0x10] sm:$0xff]  ;;  %v4138_v2 = vld [vmem:[%s4668_s0] sm:$0xff] }
   0x2   :  { %3705 = vmatprep.subr.mxu1 %v33_v0  ;;  %v31_v3 = vld [vmem:[%s4672_s4 + $0x8] sm:$0xff]  ;;  %3713 = vmatprep.mubr.msk.f32.mxu1 %vm83_vm0, %v4138_v2 }
   0x3   :  { %3706 = vmatpush3.msra.mxu1 %v33_v0 }
   0x4   :  { %13 = vsyncpa [#allocation3], 0  ;;  %3707 = vmatprep.subr.mxu1 %v32_v1  ;;  %v30_v4 = vld [vmem:[%s4672_s4] sm:$0xff]  ;;  %v4151_v5 = vld [vmem:[%s4668_s0 + $0x8] sm:$0xff]  ;;  %v4066_v6 = vmov 0.0   ;;  %vm4067_vm1 = vmmov 0  }
   0x5   :  { %3708 = vmatpush3.msra.mxu1 %v32_v1  ;;  %3726 = vmatprep.subr.mxu0 %v4066_v6  ;;  %v3520_v8 = vld [vmem:[%s4675_s7] ss:$0 sm:$0xff]  ;;  %s4068_s17 = smov 96   ;;  %vm171_vm2 = vcmask 64512   ;;  %s4069_s20 = smov 64   ;;  %vm1516_vm4 = vcmask 195584  }
   0x6   :  { %3709 = vmatprep.subr.mxu1 %v31_v3  ;;  %3728 = vmatprep.mubr.msk.f32.mxu0 %vm4067_vm1, %v4066_v6  ;;  %v165_v14 = vld [vmem:[%s4670_s2] sm:$0xff]  ;;  %s4070_s2 = smov 88   ;;  %s4071_s21 = smov 120   ;;  %vm1513_vm5 = vcmask 130048   ;;  %vm3380_vm7 = vcmask 523264  }
   0x7   :  { %3710 = vmatpush3.msra.mxu1 %v31_v3  ;;  %vm166_vm3 = vcmp.eq.f32.partialorder %v165_v14, 0.0  ;;  %s4072_s22 = smov 56   ;;  %s4073_s23 = smov 80  }
   0x8   :  { %3711 = vmatprep.subr.mxu1 %v30_v4  ;;  %v4188_v15 = vsel %vm166_vm3, -1e+09, %v4066_v6  ;;  %s4074_s24 = smov 112   ;;  %s4075_s25 = smov 48  }
   0x9   :  { %3712 = vmatpush3.msra.mxu1 %v30_v4  ;;  %s4076_s26 = smov 72   ;;  %s4077_s27 = smov 104  }
   0xa   :  { %3714 = vmatmul.mubr.msk.f32.vlgmr.msra.gmra.mxu1 %vm83_vm0, %v4151_v5  ;;  %3716 = vmatprep.subr.mxu1 %v4066_v6  ;;  %s4078_s28 = smov 40   ;;  %s4079_s29 = smov 8  }
   0xb   :  { %3718 = vmatprep.mubr.msk.f32.mxu1 %vm4067_vm1, %v4066_v6  ;;  %s4080_s30 = smov 16   ;;  %s4081_s0 = smov 24  }
   0xc   :  { %s4082_s10 = smov [#allocation2]  }
   0xd   :  { %s3509_s11 = sshll.u32 %s4082_s10, 4  ;;  %s3510_s11 = int_to_ptr.vmem [resolvable:$true] %s3509_s11 }
   0xe   :  { %s4044_s12 = scalar_lea.vmem %s3510_s11, 256  ;;  %p4049_p1 = scmp.lt.s32.totalorder %s3510_s11, %s3510_s11 }
   0xf   :  { %p4045_p0 = scmp.ne.s32.totalorder %s3510_s11, %s4044_s12  ;;  %p4050_p2 = scmp.lt.s32.totalorder %s4044_s12, %s4044_s12 }
  0x11   :  { %p4051_p3 = por %p4050_p2, %p4049_p1 }
  0x13   :  { %p4052_p4 = pnand %p4051_p3, %p4045_p0 }
  0xca   :  { %v3715_v7 = vpop.f32.mrf.mxu1 }
  0xcb   :  { %v4168_v11 = vadd.f32 %v3715_v7, %v3520_v8 }
  0xcc   :  { %v156_v9 = vpop.f32.mrf.mxu1 }
  0xcd   :  { %v4164_v10 = vadd.f32 %v3520_v8, %v156_v9 }
  0xcf   :  { %169 = vrot.lane.b32.xlu0 %v4164_v10, %s4068_s17 }
  0xd3   :  { %247 = vrot.lane.b32.xlu0 %v4168_v11, %s4068_s17 }
 0x141   :  { %v170_v12 = vpop.permute.xlu0 %169 }
 0x142   :  { %3717 = vmatpush3.xpose.msk.msra.mxu1 %vm171_vm2, %v170_v12 }
 0x143   :  { %3721 = vmatprep.subr.mxu1 %v4066_v6 }
 0x145   :  { %3719 = vmatmul.mubr.msk.f32.vlgmr.msra.gmra.mxu1 %vm171_vm2, %v4164_v10  ;;  %v248_v13 = vpop.permute.xlu0 %247 }
 0x146   :  { %3722 = vmatpush3.xpose.msk.msra.mxu1 %vm171_vm2, %v248_v13  ;;  %3723 = vmatprep.mubr.msk.f32.mxu1 %vm4067_vm1, %v4066_v6 }
 0x147   :  { %3731 = vmatprep.subr.mxu1 %v4066_v6 }
 0x149   :  { %3724 = vmatmul.mubr.msk.f32.vlgmr.msra.gmra.mxu1 %vm171_vm2, %v4168_v11 }
 0x14a   :  { %3733 = vmatprep.mubr.msk.f32.mxu1 %vm4067_vm1, %v4066_v6 }
 0x205   :  { %v242_v16 = vpop.f32.mrf.mxu1 }
 0x206   :  { %v243_v17 = vadd.f32 %v242_v16, %v4188_v15 }
 0x207   :  { %v3720_v18 = vpop.f32.mrf.mxu1 }
 0x208   :  { %v323_v19 = vsel %vm171_vm2, %v243_v17, -inf }
 0x209   :  { %324 = vmax.xlane.f32.xlu1 %v323_v19  ;;  %v319_v20 = vpop.f32.mrf.mxu1 }
 0x20a   :  { %v320_v21 = vadd.f32 %v319_v20, %v4188_v15 }
 0x20b   :  { %v3725_v22 = vpop.f32.mrf.mxu1 }
 0x20c   :  { %v326_v23 = vsel %vm171_vm2, %v320_v21, -inf }
 0x20d   :  { %327 = vmax.xlane.f32.xlu1 %v326_v23 }
 0x21e   :  { %345 = vrot.lane.b32.xlu1 %v4164_v10, %s4069_s20 }
 0x222   :  { %421 = vrot.lane.b32.xlu1 %v4168_v11, %s4069_s20 }
 0x226   :  { %499 = vrot.lane.b32.xlu1 %v4164_v10, %s4070_s2 }
 0x22a   :  { %577 = vrot.lane.b32.xlu1 %v4168_v11, %s4070_s2 }
 0x292   :  { %v325_v24 = vpop.xlane.xlu1 %324 }
 0x293   :  { %v329_v25 = vsub.f32 %v243_v17, %v325_v24 }
 0x295   :  { %v331_v26 = vmul.f32 1.442695, %v329_v25 }
 0x296   :  { %v328_v27 = vpop.xlane.xlu1 %327 }
 0x297   :  { %3968 = vpow2.f32 %v331_v26  ;;  %v330_v28 = vsub.f32 %v320_v21, %v328_v27 }
 0x299   :  { %v333_v29 = vmul.f32 1.442695, %v330_v28 }
 0x29a   :  { %v346_v30 = vpop.permute.xlu1 %345 }
 0x29b   :  { %3970 = vpow2.f32 %v333_v29  ;;  %3727 = vmatpush3.msra.mxu0 %v346_v30 }
 0x29c   :  { %3736 = vmatprep.subr.mxu0 %v4066_v6 }
 0x29e   :  { %v422_v31 = vpop.permute.xlu1 %421 }
 0x29f   :  { %3732 = vmatpush3.msra.mxu1 %v422_v31 }
 0x2a0   :  { %3741 = vmatprep.subr.mxu1 %v4066_v6 }
 0x2a2   :  { %v500_v36 = vpop.permute.xlu1 %499 }
 0x2a4   :  { %v3969_v32 = vpop.eup %3968 }
 0x2a5   :  { %v335_v33 = vsel %vm171_vm2, %v3969_v32, 0.0 }
 0x2a6   :  { %336 = vadd.xlane.f32.xlu0 %v335_v33  ;;  %v578_v37 = vpop.permute.xlu1 %577 }
 0x2a8   :  { %v3971_v34 = vpop.eup %3970 }
 0x2a9   :  { %v338_v35 = vsel %vm171_vm2, %v3971_v34, 0.0 }
 0x2aa   :  { %339 = vadd.xlane.f32.xlu1 %v338_v35 }
 0x2bb   :  { %575 = vrot.lane.b32.xlu1 %v4168_v11, %s4071_s21 }
 0x2bc   :  { %497 = vrot.lane.b32.xlu0 %v4164_v10, %s4071_s21 }
 0x32f   :  { %v337_v38 = vpop.xlane.xlu0 %336 }
 0x330   :  { %3972 = vrcp.f32 %v337_v38 }
 0x333   :  { %v340_v39 = vpop.xlane.xlu1 %339  ;;  %v498_v44 = vpop.permute.xlu0 %497 }
 0x334   :  { %3974 = vrcp.f32 %v340_v39 }
 0x337   :  { %v576_v45 = vpop.permute.xlu1 %575 }
 0x33d   :  { %v3973_v40 = vpop.eup %3972 }
 0x33e   :  { %v343_v41 = vmul.f32 %v3973_v40, %v3969_v32 }
 0x340   :  { %3729 = vmatmul.mubr.msk.f32.vlgmr.msra.gmra.mxu0 %vm171_vm2, %v343_v41 }
 0x341   :  { %v3975_v42 = vpop.eup %3974  ;;  %3737 = vmatpush3.xpose.msk.msra.mxu0 %vm171_vm2, %v500_v36  ;;  %3738 = vmatprep.mubr.msk.f32.mxu0 %vm4067_vm1, %v4066_v6 }
 0x342   :  { %v344_v43 = vmul.f32 %v3975_v42, %v3971_v34  ;;  %3746 = vmatprep.subr.mxu0 %v4066_v6 }
 0x344   :  { %3734 = vmatmul.mubr.msk.f32.vlgmr.msra.gmra.mxu1 %vm171_vm2, %v344_v43  ;;  %3739 = vmatmul.mubr.msk.f32.vlgmr.msra.gmra.mxu0 %vm171_vm2, %v498_v44 }
 0x345   :  { %3742 = vmatpush3.xpose.msk.msra.mxu1 %vm171_vm2, %v578_v37  ;;  %3743 = vmatprep.mubr.msk.f32.mxu1 %vm4067_vm1, %v4066_v6 }
 0x346   :  { %3751 = vmatprep.subr.mxu1 %v4066_v6  ;;  %3748 = vmatprep.mubr.msk.f32.mxu0 %vm4067_vm1, %v4066_v6 }
 0x348   :  { %3744 = vmatmul.mubr.msk.f32.vlgmr.msra.gmra.mxu1 %vm171_vm2, %v576_v45 }
 0x349   :  { %3753 = vmatprep.mubr.msk.f32.mxu1 %vm4067_vm1, %v4066_v6 }
 0x400   :  { %v4224_v46 = vpop.f32.mrf.mxu0 }
 0x402   :  { %v3730_v47 = vpop.f32.mrf.mxu0 }
 0x404   :  { %v4226_v48 = vpop.f32.mrf.mxu1  ;;  %v571_v49 = vpop.f32.mrf.mxu0 }
 0x405   :  { %v572_v50 = vadd.f32 %v571_v49, %v4188_v15 }
 0x406   :  { %v3735_v51 = vpop.f32.mrf.mxu1  ;;  %v3740_v52 = vpop.f32.mrf.mxu0 }
 0x407   :  { %v653_v53 = vsel %vm171_vm2, %v572_v50, -inf }
 0x408   :  { %v649_v54 = vpop.f32.mrf.mxu1  ;;  %654 = vmax.xlane.f32.xlu1 %v653_v53 }
 0x409   :  { %v650_v55 = vadd.f32 %v649_v54, %v4188_v15 }
 0x40a   :  { %v3745_v56 = vpop.f32.mrf.mxu1 }
 0x40b   :  { %v656_v57 = vsel %vm171_vm2, %v650_v55, -inf }
 0x40c   :  { %657 = vmax.xlane.f32.xlu0 %v656_v57 }
 0x419   :  { %675 = vrot.lane.b32.xlu1 %v4164_v10, %s4072_s22 }
 0x41d   :  { %829 = vrot.lane.b32.xlu1 %v4164_v10, %s4073_s23 }
 0x421   :  { %907 = vrot.lane.b32.xlu1 %v4168_v11, %s4073_s23 }
 0x422   :  { %751 = vrot.lane.b32.xlu0 %v4168_v11, %s4072_s22 }
 0x426   :  { %827 = vrot.lane.b32.xlu0 %v4164_v10, %s4074_s24 }
 0x491   :  { %v655_v58 = vpop.xlane.xlu1 %654 }
 0x492   :  { %v659_v59 = vsub.f32 %v572_v50, %v655_v58 }
 0x494   :  { %v661_v60 = vmul.f32 1.442695, %v659_v59 }
 0x495   :  { %v676_v61 = vpop.permute.xlu1 %675  ;;  %v658_v62 = vpop.xlane.xlu0 %657 }
 0x496   :  { %3976 = vpow2.f32 %v661_v60  ;;  %v660_v63 = vsub.f32 %v650_v55, %v658_v62  ;;  %3747 = vmatpush3.msra.mxu0 %v676_v61 }
 0x497   :  { %3756 = vmatprep.subr.mxu0 %v4066_v6 }
 0x498   :  { %v663_v0 = vmul.f32 1.442695, %v660_v63 }
 0x499   :  { %v752_v1 = vpop.permute.xlu0 %751  ;;  %v830_v9 = vpop.permute.xlu1 %829 }
 0x49a   :  { %3978 = vpow2.f32 %v663_v0  ;;  %3752 = vmatpush3.msra.mxu1 %v752_v1 }
 0x49b   :  { %3761 = vmatprep.subr.mxu1 %v4066_v6 }
 0x49d   :  { %v908_v12 = vpop.permute.xlu1 %907  ;;  %v828_v20 = vpop.permute.xlu0 %827 }
 0x4a3   :  { %v3977_v3 = vpop.eup %3976 }
 0x4a4   :  { %v665_v4 = vsel %vm171_vm2, %v3977_v3, 0.0 }
 0x4a5   :  { %666 = vadd.xlane.f32.xlu1 %v665_v4 }
 0x4a7   :  { %v3979_v7 = vpop.eup %3978 }
 0x4a8   :  { %v668_v8 = vsel %vm171_vm2, %v3979_v7, 0.0 }
 0x4a9   :  { %669 = vadd.xlane.f32.xlu1 %v668_v8 }
 0x4ba   :  { %905 = vrot.lane.b32.xlu1 %v4168_v11, %s4074_s24 }
 0x52e   :  { %v667_v13 = vpop.xlane.xlu1 %666 }
 0x52f   :  { %3980 = vrcp.f32 %v667_v13 }
 0x532   :  { %v670_v14 = vpop.xlane.xlu1 %669 }
 0x533   :  { %3982 = vrcp.f32 %v670_v14 }
 0x536   :  { %v906_v21 = vpop.permute.xlu1 %905 }
 0x53c   :  { %v3981_v16 = vpop.eup %3980 }
 0x53d   :  { %v673_v17 = vmul.f32 %v3981_v16, %v3977_v3 }
 0x53f   :  { %3749 = vmatmul.mubr.msk.f32.vlgmr.msra.gmra.mxu0 %vm171_vm2, %v673_v17 }
 0x540   :  { %v3983_v18 = vpop.eup %3982  ;;  %3757 = vmatpush3.xpose.msk.msra.mxu0 %vm171_vm2, %v830_v9  ;;  %3758 = vmatprep.mubr.msk.f32.mxu0 %vm4067_vm1, %v4066_v6 }
 0x541   :  { %v674_v19 = vmul.f32 %v3983_v18, %v3979_v7  ;;  %3766 = vmatprep.subr.mxu0 %v4066_v6 }
 0x543   :  { %3754 = vmatmul.mubr.msk.f32.vlgmr.msra.gmra.mxu1 %vm171_vm2, %v674_v19  ;;  %3759 = vmatmul.mubr.msk.f32.vlgmr.msra.gmra.mxu0 %vm171_vm2, %v828_v20 }
 0x544   :  { %3762 = vmatpush3.xpose.msk.msra.mxu1 %vm171_vm2, %v908_v12  ;;  %3763 = vmatprep.mubr.msk.f32.mxu1 %vm4067_vm1, %v4066_v6 }
 0x545   :  { %3771 = vmatprep.subr.mxu1 %v4066_v6  ;;  %3768 = vmatprep.mubr.msk.f32.mxu0 %vm4067_vm1, %v4066_v6 }
 0x547   :  { %3764 = vmatmul.mubr.msk.f32.vlgmr.msra.gmra.mxu1 %vm171_vm2, %v906_v21 }
 0x548   :  { %3773 = vmatprep.mubr.msk.f32.mxu1 %vm4067_vm1, %v4066_v6 }
 0x5ff   :  { %v4262_v22 = vpop.f32.mrf.mxu0 }
 0x601   :  { %v3750_v23 = vpop.f32.mrf.mxu0 }
 0x603   :  { %v4264_v24 = vpop.f32.mrf.mxu1  ;;  %v901_v25 = vpop.f32.mrf.mxu0 }
 0x604   :  { %v902_v26 = vadd.f32 %v901_v25, %v4188_v15 }
 0x605   :  { %v3755_v27 = vpop.f32.mrf.mxu1  ;;  %v3760_v28 = vpop.f32.mrf.mxu0 }
 0x606   :  { %v983_v29 = vsel %vm171_vm2, %v902_v26, -inf  ;;  %v48_v28 = vld [vmem:[%s4674_s6 + $0x30] sm:$0xff] }
 0x607   :  { %v979_v30 = vpop.f32.mrf.mxu1  ;;  %984 = vmax.xlane.f32.xlu0 %v983_v29  ;;  %v47_v29 = vld [vmem:[%s4674_s6 + $0x28] sm:$0xff] }
 0x608   :  { %v980_v31 = vadd.f32 %v979_v30, %v4188_v15  ;;  %v46_v30 = vld [vmem:[%s4674_s6 + $0x20] sm:$0xff] }
 0x609   :  { %v3765_v32 = vpop.f32.mrf.mxu1 }
 0x60a   :  { %v986_v33 = vsel %vm171_vm2, %v980_v31, -inf }
 0x60b   :  { %987 = vmax.xlane.f32.xlu1 %v986_v33 }
 0x61c   :  { %1005 = vrot.lane.b32.xlu1 %v4164_v10, %s4075_s25 }
 0x61d   :  { %1081 = vrot.lane.b32.xlu0 %v4168_v11, %s4075_s25 }
 0x620   :  { %1159 = vrot.lane.b32.xlu1 %v4164_v10, %s4076_s26 }
 0x624   :  { %1237 = vrot.lane.b32.xlu1 %v4168_v11, %s4076_s26 }
 0x628   :  { %1235 = vrot.lane.b32.xlu1 %v4168_v11, %s4077_s27 }
 0x690   :  { %v985_v34 = vpop.xlane.xlu0 %984 }
 0x691   :  { %v989_v35 = vsub.f32 %v902_v26, %v985_v34 }
 0x693   :  { %v991_v36 = vmul.f32 1.442695, %v989_v35 }
 0x694   :  { %v988_v37 = vpop.xlane.xlu1 %987  ;;  %v1082_v38 = vpop.permute.xlu0 %1081 }
 0x695   :  { %3984 = vpow2.f32 %v991_v36  ;;  %v990_v39 = vsub.f32 %v980_v31, %v988_v37  ;;  %3772 = vmatpush3.msra.mxu1 %v1082_v38 }
 0x696   :  { %3781 = vmatprep.subr.mxu1 %v4066_v6 }
 0x697   :  { %v993_v40 = vmul.f32 1.442695, %v990_v39 }
 0x698   :  { %v1006_v41 = vpop.permute.xlu1 %1005 }
 0x699   :  { %3986 = vpow2.f32 %v993_v40  ;;  %3767 = vmatpush3.msra.mxu0 %v1006_v41 }
 0x69a   :  { %3776 = vmatprep.subr.mxu0 %v4066_v6 }
 0x69c   :  { %v1160_v50 = vpop.permute.xlu1 %1159 }
 0x6a0   :  { %v1238_v54 = vpop.permute.xlu1 %1237 }
 0x6a2   :  { %v3985_v42 = vpop.eup %3984 }
 0x6a3   :  { %v995_v43 = vsel %vm171_vm2, %v3985_v42, 0.0 }
 0x6a4   :  { %996 = vadd.xlane.f32.xlu0 %v995_v43  ;;  %v1236_v57 = vpop.permute.xlu1 %1235 }
 0x6a6   :  { %v3987_v44 = vpop.eup %3986 }
 0x6a7   :  { %v998_v45 = vsel %vm171_vm2, %v3987_v44, 0.0 }
 0x6a8   :  { %999 = vadd.xlane.f32.xlu0 %v998_v45 }
 0x6be   :  { %1157 = vrot.lane.b32.xlu0 %v4164_v10, %s4077_s27 }
 0x72d   :  { %v997_v47 = vpop.xlane.xlu0 %996 }
 0x72e   :  { %3988 = vrcp.f32 %v997_v47 }
 0x731   :  { %v1000_v49 = vpop.xlane.xlu0 %999 }
 0x732   :  { %3990 = vrcp.f32 %v1000_v49 }
 0x735   :  { %v1158_v56 = vpop.permute.xlu0 %1157 }
 0x73b   :  { %v3989_v51 = vpop.eup %3988 }
 0x73c   :  { %v1003_v52 = vmul.f32 %v3989_v51, %v3985_v42 }
 0x73e   :  { %3769 = vmatmul.mubr.msk.f32.vlgmr.msra.gmra.mxu0 %vm171_vm2, %v1003_v52 }
 0x73f   :  { %v3991_v53 = vpop.eup %3990  ;;  %3777 = vmatpush3.xpose.msk.msra.mxu0 %vm171_vm2, %v1160_v50  ;;  %3778 = vmatprep.mubr.msk.f32.mxu0 %vm4067_vm1, %v4066_v6 }
 0x740   :  { %v1004_v55 = vmul.f32 %v3991_v53, %v3987_v44  ;;  %3786 = vmatprep.subr.mxu0 %v4066_v6 }
 0x742   :  { %3774 = vmatmul.mubr.msk.f32.vlgmr.msra.gmra.mxu1 %vm171_vm2, %v1004_v55  ;;  %3779 = vmatmul.mubr.msk.f32.vlgmr.msra.gmra.mxu0 %vm171_vm2, %v1158_v56 }
 0x743   :  { %3782 = vmatpush3.xpose.msk.msra.mxu1 %vm171_vm2, %v1238_v54  ;;  %3783 = vmatprep.mubr.msk.f32.mxu1 %vm4067_vm1, %v4066_v6 }
 0x744   :  { %3791 = vmatprep.subr.mxu1 %v4066_v6  ;;  %3788 = vmatprep.mubr.msk.f32.mxu0 %vm4067_vm1, %v4066_v6 }
 0x746   :  { %3784 = vmatmul.mubr.msk.f32.vlgmr.msra.gmra.mxu1 %vm171_vm2, %v1236_v57 }
 0x747   :  { %3793 = vmatprep.mubr.msk.f32.mxu1 %vm4067_vm1, %v4066_v6 }
 0x7fe   :  { %v1077_v58 = vpop.f32.mrf.mxu0 }
 0x800   :  { %v3770_v59 = vpop.f32.mrf.mxu0 }
 0x802   :  { %v1153_v60 = vpop.f32.mrf.mxu1  ;;  %v1231_v61 = vpop.f32.mrf.mxu0 }
 0x803   :  { %v1232_v62 = vadd.f32 %v1231_v61, %v4188_v15 }
 0x804   :  { %v3775_v63 = vpop.f32.mrf.mxu1  ;;  %v3780_v0 = vpop.f32.mrf.mxu0 }
 0x805   :  { %v1313_v1 = vsel %vm171_vm2, %v1232_v62, -inf }
 0x806   :  { %v1309_v3 = vpop.f32.mrf.mxu1  ;;  %1314 = vmax.xlane.f32.xlu0 %v1313_v1  ;;  %v36_v1 = vld [vmem:[%s4673_s5 + $0x10] sm:$0xff] }
 0x807   :  { %v1310_v4 = vadd.f32 %v1309_v3, %v4188_v15  ;;  %v45_v3 = vld [vmem:[%s4674_s6 + $0x18] sm:$0xff] }
 0x808   :  { %v3785_v7 = vpop.f32.mrf.mxu1 }
 0x809   :  { %v1316_v8 = vsel %vm171_vm2, %v1310_v4, -inf  ;;  %v35_v7 = vld [vmem:[%s4673_s5 + $0x8] sm:$0xff] }
 0x80a   :  { %1317 = vmax.xlane.f32.xlu1 %v1316_v8  ;;  %v77_v8 = vld [vmem:[%s4669_s1] sm:$0xff] }
 0x81b   :  { %1335 = vrot.lane.b32.xlu1 %v4164_v10, %s4078_s28 }
 0x81f   :  { %1489 = vrot.lane.b32.xlu1 %v4262_v22, %s4079_s29 }
 0x823   :  { %1491 = vrot.lane.b32.xlu1 %v4264_v24, %s4079_s29 }
 0x827   :  { %1499 = vrot.lane.b32.xlu1 %v1153_v60, %s4080_s30 }
 0x88f   :  { %v1315_v9 = vpop.xlane.xlu0 %1314 }
 0x890   :  { %v1319_v12 = vsub.f32 %v1232_v62, %v1315_v9  ;;  %v34_v9 = vld [vmem:[%s4673_s5] sm:$0xff] }
 0x892   :  { %v1321_v15 = vmul.f32 1.442695, %v1319_v12  ;;  %v43_v12 = vld [vmem:[%s4674_s6 + $0x8] sm:$0xff] }
 0x893   :  { %v1318_v13 = vpop.xlane.xlu1 %1317 }
 0x894   :  { %3992 = vpow2.f32 %v1321_v15  ;;  %v1320_v14 = vsub.f32 %v1310_v4, %v1318_v13  ;;  %v44_v4 = vld [vmem:[%s4674_s6 + $0x10] sm:$0xff]  ;;  %v78_v15 = vld [vmem:[%s4669_s1 + $0x8] sm:$0xff]  ;;  %v42_v13 = vld [vmem:[%s4674_s6] sm:$0xff] }
 0x896   :  { %v1323_v16 = vmul.f32 1.442695, %v1320_v14 }
 0x897   :  { %v1336_v17 = vpop.permute.xlu1 %1335 }
 0x898   :  { %3994 = vpow2.f32 %v1323_v16  ;;  %3787 = vmatpush3.msra.mxu0 %v1336_v17 }
 0x89b   :  { %v1490_v35 = vpop.permute.xlu1 %1489 }
 0x89c   :  { %v1511_v38 = vsel %vm171_vm2, %v4224_v46, %v1490_v35  ;;  %v3547_v46 = vld [vmem:[%s4675_s7 + $0x3] ss:$0 sm:$0xff]  ;;  %v3552_v35 = vld [vmem:[%s4675_s7 + $0x1] ss:$0 sm:$0xff] }
 0x89f   :  { %v1492_v36 = vpop.permute.xlu1 %1491 }
 0x8a0   :  { %v1512_v43 = vsel %vm171_vm2, %v4226_v48, %v1492_v36 }
 0x8a1   :  { %v3993_v10 = vpop.eup %3992 }
 0x8a2   :  { %v1325_v18 = vsel %vm171_vm2, %v3993_v10, 0.0 }
 0x8a3   :  { %1326 = vadd.xlane.f32.xlu0 %v1325_v18  ;;  %v1500_v39 = vpop.permute.xlu1 %1499 }
 0x8a4   :  { %v1515_v44 = vsel %vm1513_vm5, %v1512_v43, %v1500_v39  ;;  %v1815_v39 = vld [vmem:[%s4671_s3] sm:$0xff] }
 0x8a5   :  { %v3995_v19 = vpop.eup %3994  ;;  %vm1816_vm6 = vcmp.eq.f32.partialorder %v1815_v39, 0.0 }
 0x8a6   :  { %v1328_v20 = vsel %vm171_vm2, %v3995_v19, 0.0 }
 0x8a7   :  { %1329 = vadd.xlane.f32.xlu0 %v1328_v20 }
 0x8bd   :  { %1411 = vrot.lane.b32.xlu0 %v4168_v11, %s4078_s28  ;;  %v49_v11 = vld [vmem:[%s4674_s6 + $0x38] sm:$0xff] }
 0x8be   :  { %3796 = vmatprep.subr.mxu0 %v49_v11 }
 0x8c1   :  { %1497 = vrot.lane.b32.xlu0 %v1077_v58, %s4080_s30 }
 0x92c   :  { %v1327_v21 = vpop.xlane.xlu0 %1326 }
 0x92d   :  { %3996 = vrcp.f32 %v1327_v21  ;;  %v3550_v21 = vld [vmem:[%s4675_s7 + $0x7] ss:$0 sm:$0xff] }
 0x930   :  { %v1330_v22 = vpop.xlane.xlu0 %1329 }
 0x931   :  { %3998 = vrcp.f32 %v1330_v22 }
 0x934   :  { %v1412_v23 = vpop.permute.xlu0 %1411 }
 0x935   :  { %3792 = vmatpush3.msra.mxu1 %v1412_v23  ;;  %v3551_v23 = vld [vmem:[%s4675_s7 + $0x8] ss:$0 sm:$0xff] }
 0x936   :  { %3807 = vmatprep.subr.mxu1 %v45_v3 }
 0x938   :  { %v1498_v37 = vpop.permute.xlu0 %1497 }
 0x939   :  { %v1514_v40 = vsel %vm1513_vm5, %v1511_v38, %v1498_v37 }
 0x93a   :  { %v3997_v24 = vpop.eup %3996 }
 0x93b   :  { %v1333_v25 = vmul.f32 %v3997_v24, %v3993_v10 }
 0x93d   :  { %3789 = vmatmul.mubr.msk.f32.vlgmr.msra.gmra.mxu0 %vm171_vm2, %v1333_v25 }
 0x93e   :  { %v3999_v26 = vpop.eup %3998  ;;  %3797 = vmatpush3.msra.mxu0 %v49_v11 }
 0x93f   :  { %v1334_v27 = vmul.f32 %v3999_v26, %v3995_v19  ;;  %3798 = vmatprep.subr.mxu0 %v48_v28 }
 0x940   :  { %3799 = vmatpush3.msra.mxu0 %v48_v28 }
 0x941   :  { %3794 = vmatmul.mubr.msk.f32.vlgmr.msra.gmra.mxu1 %vm171_vm2, %v1334_v27  ;;  %3800 = vmatprep.subr.mxu0 %v47_v29 }
 0x942   :  { %3801 = vmatpush3.msra.mxu0 %v47_v29  ;;  %3808 = vmatpush3.msra.mxu1 %v45_v3  ;;  %v3555_v29 = vld [vmem:[%s4675_s7 + $0x2] ss:$0 sm:$0xff] }
 0x943   :  { %3802 = vmatprep.subr.mxu0 %v46_v30  ;;  %3809 = vmatprep.subr.mxu1 %v44_v4 }
 0x944   :  { %3803 = vmatpush3.msra.mxu0 %v46_v30  ;;  %3810 = vmatpush3.msra.mxu1 %v44_v4 }
 0x945   :  { %3811 = vmatprep.subr.mxu1 %v43_v12 }
 0x946   :  { %3812 = vmatpush3.msra.mxu1 %v43_v12 }
 0x947   :  { %3813 = vmatprep.subr.mxu1 %v42_v13 }
 0x948   :  { %3814 = vmatpush3.msra.mxu1 %v42_v13 }
 0x949   :  { %3829 = vmatprep.subr.mxu1 %v4066_v6 }
 0x9fd   :  { %v1407_v31 = vpop.f32.mrf.mxu0 }
 0x9fe   :  { %1505 = vrot.lane.b32.xlu0 %v1407_v31, %s4081_s0 }
 0x9ff   :  { %v3790_v32 = vpop.f32.mrf.mxu0 }
 0xa01   :  { %v1483_v33 = vpop.f32.mrf.mxu1 }
 0xa02   :  { %1507 = vrot.lane.b32.xlu1 %v1483_v33, %s4081_s0 }
 0xa03   :  { %v3795_v34 = vpop.f32.mrf.mxu1 }
 0xa70   :  { %v1506_v41 = vpop.permute.xlu0 %1505 }
 0xa71   :  { %v1517_v42 = vsel %vm1516_vm4, %v1514_v40, %v1506_v41  ;;  %v4433_v40 = vsel %vm1816_vm6, -1e+09, %v4066_v6 }
 0xa72   :  { %3804 = vmatprep.mubr.msk.f32.mxu0 %vm83_vm0, %v1517_v42 }
 0xa74   :  { %v1508_v45 = vpop.permute.xlu1 %1507 }
 0xa75   :  { %v1518_v47 = vsel %vm1516_vm4, %v1515_v44, %v1508_v45 }
 0xa76   :  { %3805 = vmatmul.mubr.msk.f32.vlgmr.msra.gmra.mxu0 %vm83_vm0, %v1518_v47 }
 0xa77   :  { %3826 = vmatprep.mubr.msk.f32.mxu0 %vm83_vm0, %v77_v8 }
 0xb36   :  { %v3806_v49 = vpop.f32.mrf.mxu0 }
 0xb37   :  { %v1601_v50 = vadd.f32 %v3806_v49, %v3547_v46 }
 0xb38   :  { %v1595_v51 = vpop.f32.mrf.mxu0 }
 0xb39   :  { %v1596_v52 = vadd.f32 %v3547_v46, %v1595_v51  ;;  %v1605_v53 = vadd.f32 %v1601_v50, %v4151_v5 }
 0xb3b   :  { %v1609_v54 = vsel %vm83_vm0, %v1605_v53, 0.0  ;;  %v1604_v48 = vadd.f32 %v1596_v52, %v4138_v2  ;;  %v37_v2 = vld [vmem:[%s4673_s5 + $0x18] sm:$0xff] }
 0xb3c   :  { %1610 = vadd.xlane.f32.xlu1 %v1609_v54  ;;  %3818 = vmatprep.subr.mxu0 %v37_v2 }
 0xb3d   :  { %v1606_v55 = vsel %vm83_vm0, %v1604_v48, 0.0  ;;  %3819 = vmatpush3.msra.mxu0 %v37_v2 }
 0xb3e   :  { %1607 = vadd.xlane.f32.xlu0 %v1606_v55  ;;  %3820 = vmatprep.subr.mxu0 %v36_v1 }
 0xb3f   :  { %3821 = vmatpush3.msra.mxu0 %v36_v1 }
 0xb40   :  { %3822 = vmatprep.subr.mxu0 %v35_v7 }
 0xb41   :  { %3823 = vmatpush3.msra.mxu0 %v35_v7 }
 0xb42   :  { %3824 = vmatprep.subr.mxu0 %v34_v9 }
 0xb43   :  { %3825 = vmatpush3.msra.mxu0 %v34_v9 }
 0xb44   :  { %3827 = vmatmul.mubr.msk.f32.vlgmr.msra.gmra.mxu0 %vm83_vm0, %v78_v15  ;;  %3839 = vmatprep.subr.mxu0 %v4066_v6 }
 0xb45   :  { %3841 = vmatprep.mubr.msk.f32.mxu0 %vm4067_vm1, %v4066_v6 }
 0xbc5   :  { %v1611_v56 = vpop.xlane.xlu1 %1610 }
 0xbc6   :  { %v1614_v57 = vmul.f32 0.03125, %v1611_v56 }
 0xbc7   :  { %v1608_v58 = vpop.xlane.xlu0 %1607 }
 0xbc8   :  { %v1613_v59 = vmul.f32 0.03125, %v1608_v58  ;;  %v1616_v60 = vsub.f32 %v1605_v53, %v1614_v57 }
 0xbca   :  { %v1615_v61 = vsub.f32 %v1604_v48, %v1613_v59  ;;  %v1618_v0 = vmul.f32 %v1616_v60, %v1616_v60 }
 0xbcc   :  { %v1617_v62 = vmul.f32 %v1615_v61, %v1615_v61  ;;  %v1622_v5 = vsel %vm83_vm0, %v1618_v0, 0.0 }
 0xbce   :  { %v1619_v63 = vsel %vm83_vm0, %v1617_v62, 0.0 }
 0xbcf   :  { %1620 = vadd.xlane.f32.xlu0 %v1619_v63 }
 0xbd3   :  { %1623 = vadd.xlane.f32.xlu0 %v1622_v5 }
 0xc04   :  { %v3828_v30 = vpop.f32.mrf.mxu0 }
 0xc05   :  { %v4404_v31 = vadd.f32 %v3828_v30, %v3555_v29 }
 0xc06   :  { %v1806_v32 = vpop.f32.mrf.mxu0 }
 0xc07   :  { %v4406_v33 = vadd.f32 %v3555_v29, %v1806_v32 }
 0xc58   :  { %v1621_v14 = vpop.xlane.xlu0 %1620 }
 0xc59   :  { %v1625_v16 = vmul.f32 0.03125, %v1621_v14 }
 0xc5b   :  { %v1627_v17 = vadd.f32 1e-05, %v1625_v16 }
 0xc5c   :  { %v1624_v10 = vpop.xlane.xlu0 %1623 }
 0xc5d   :  { %4000 = vrsqrt.f32 %v1627_v17  ;;  %v1626_v18 = vmul.f32 0.03125, %v1624_v10 }
 0xc5f   :  { %v1628_v19 = vadd.f32 1e-05, %v1626_v18 }
 0xc61   :  { %4002 = vrsqrt.f32 %v1628_v19 }
 0xc6a   :  { %v4001_v20 = vpop.eup %4000 }
 0xc6b   :  { %v1631_v22 = vmul.f32 %v4001_v20, %v1615_v61 }
 0xc6d   :  { %v1637_v24 = vmul.f32 %v3550_v21, %v1631_v22 }
 0xc6e   :  { %v4003_v25 = vpop.eup %4002 }
 0xc6f   :  { %v1632_v26 = vmul.f32 %v4003_v25, %v1616_v60  ;;  %v4391_v27 = vadd.f32 %v3551_v23, %v1637_v24 }
 0xc71   :  { %v1638_v11 = vmul.f32 %v3550_v21, %v1632_v26  ;;  %3815 = vmatprep.mubr.msk.f32.mxu1 %vm83_vm0, %v4391_v27 }
 0xc73   :  { %v4395_v28 = vadd.f32 %v3551_v23, %v1638_v11 }
 0xc75   :  { %3816 = vmatmul.mubr.msk.f32.vlgmr.msra.gmra.mxu1 %vm83_vm0, %v4395_v28 }
 0xc76   :  { %3831 = vmatprep.mubr.msk.f32.mxu1 %vm4067_vm1, %v4066_v6  ;;  %3830 = vmatpush3.xpose.msk.msra.mxu1 %vm171_vm2, %v4406_v33 }
 0xc77   :  { %3834 = vmatprep.subr.mxu1 %v4066_v6 }
 0xd35   :  { %v3817_v34 = vpop.f32.mrf.mxu1 }
 0xd36   :  { %v4422_v38 = vadd.f32 %v3817_v34, %v3552_v35 }
 0xd37   :  { %v1721_v36 = vpop.f32.mrf.mxu1 }
 0xd38   :  { %v4414_v37 = vadd.f32 %v3552_v35, %v1721_v36 }
 0xd3a   :  { %3832 = vmatmul.mubr.msk.f32.vlgmr.msra.gmra.mxu1 %vm171_vm2, %v4414_v37 }
 0xd3b   :  { %3835 = vmatpush3.xpose.msk.msra.mxu1 %vm171_vm2, %v4404_v31  ;;  %3836 = vmatprep.mubr.msk.f32.mxu1 %vm4067_vm1, %v4066_v6 }
 0xd3c   :  { %3844 = vmatprep.subr.mxu1 %v4066_v6 }
 0xd3e   :  { %3837 = vmatmul.mubr.msk.f32.vlgmr.msra.gmra.mxu1 %vm171_vm2, %v4422_v38 }
 0xd3f   :  { %3846 = vmatprep.mubr.msk.f32.mxu1 %vm4067_vm1, %v4066_v6 }
 0xdfa   :  { %v1890_v41 = vpop.f32.mrf.mxu1 }
 0xdfb   :  { %v1891_v42 = vadd.f32 %v1890_v41, %v4433_v40 }
 0xdfc   :  { %v3833_v43 = vpop.f32.mrf.mxu1 }
 0xdfd   :  { %v1970_v44 = vsel %vm171_vm2, %v1891_v42, -inf }
 0xdfe   :  { %1971 = vmax.xlane.f32.xlu1 %v1970_v44  ;;  %v1966_v45 = vpop.f32.mrf.mxu1 }
 0xdff   :  { %v1967_v47 = vadd.f32 %v1966_v45, %v4433_v40 }
 0xe00   :  { %v3838_v46 = vpop.f32.mrf.mxu1 }
 0xe01   :  { %v1973_v49 = vsel %vm171_vm2, %v1967_v47, -inf }
 0xe02   :  { %1974 = vmax.xlane.f32.xlu0 %v1973_v49 }
 0xe0f   :  { %1992 = vrot.lane.b32.xlu1 %v4406_v33, %s4068_s17 }
 0xe13   :  { %2146 = vrot.lane.b32.xlu1 %v4406_v33, %s4071_s21 }
 0xe17   :  { %2224 = vrot.lane.b32.xlu1 %v4404_v31, %s4071_s21 }
 0xe18   :  { %2068 = vrot.lane.b32.xlu0 %v4404_v31, %s4068_s17 }
 0xe87   :  { %v1972_v50 = vpop.xlane.xlu1 %1971 }
 0xe88   :  { %v1976_v51 = vsub.f32 %v1891_v42, %v1972_v50 }
 0xe8a   :  { %v1978_v52 = vmul.f32 1.442695, %v1976_v51 }
 0xe8b   :  { %v1993_v53 = vpop.permute.xlu1 %1992  ;;  %v1975_v54 = vpop.xlane.xlu0 %1974 }
 0xe8c   :  { %4004 = vpow2.f32 %v1978_v52  ;;  %v1977_v48 = vsub.f32 %v1967_v47, %v1975_v54  ;;  %3840 = vmatpush3.msra.mxu0 %v1993_v53 }
 0xe8d   :  { %3849 = vmatprep.subr.mxu0 %v4066_v6 }
 0xe8e   :  { %v1980_v55 = vmul.f32 1.442695, %v1977_v48 }
 0xe8f   :  { %v2069_v56 = vpop.permute.xlu0 %2068  ;;  %v2147_v61 = vpop.permute.xlu1 %2146 }
 0xe90   :  { %4006 = vpow2.f32 %v1980_v55  ;;  %3845 = vmatpush3.msra.mxu1 %v2069_v56 }
 0xe91   :  { %3854 = vmatprep.subr.mxu1 %v4066_v6 }
 0xe93   :  { %v2225_v62 = vpop.permute.xlu1 %2224 }
 0xe99   :  { %v4005_v57 = vpop.eup %4004 }
 0xe9a   :  { %v1982_v58 = vsel %vm171_vm2, %v4005_v57, 0.0 }
 0xe9b   :  { %1983 = vadd.xlane.f32.xlu1 %v1982_v58 }
 0xe9d   :  { %v4007_v59 = vpop.eup %4006 }
 0xe9e   :  { %v1985_v60 = vsel %vm171_vm2, %v4007_v59, 0.0 }
 0xe9f   :  { %1986 = vadd.xlane.f32.xlu0 %v1985_v60 }
 0xeac   :  { %2222 = vrot.lane.b32.xlu1 %v4422_v38, %s4071_s21 }
 0xeb5   :  { %2144 = vrot.lane.b32.xlu0 %v4414_v37, %s4071_s21 }
 0xf24   :  { %v1984_v63 = vpop.xlane.xlu1 %1983 }
 0xf25   :  { %4008 = vrcp.f32 %v1984_v63 }
 0xf28   :  { %v1987_v0 = vpop.xlane.xlu0 %1986  ;;  %v2223_v7 = vpop.permute.xlu1 %2222 }
 0xf29   :  { %4010 = vrcp.f32 %v1987_v0 }
 0xf2c   :  { %v2145_v4 = vpop.permute.xlu0 %2144 }
 0xf32   :  { %v4009_v5 = vpop.eup %4008 }
 0xf33   :  { %v1990_v2 = vmul.f32 %v4009_v5, %v4005_v57 }
 0xf35   :  { %3842 = vmatmul.mubr.msk.f32.vlgmr.msra.gmra.mxu0 %vm171_vm2, %v1990_v2 }
 0xf36   :  { %v4011_v1 = vpop.eup %4010  ;;  %3850 = vmatpush3.xpose.msk.msra.mxu0 %vm171_vm2, %v2147_v61  ;;  %3851 = vmatprep.mubr.msk.f32.mxu0 %vm4067_vm1, %v4066_v6 }
 0xf37   :  { %v1991_v3 = vmul.f32 %v4011_v1, %v4007_v59  ;;  %3859 = vmatprep.subr.mxu0 %v4066_v6 }
 0xf39   :  { %3847 = vmatmul.mubr.msk.f32.vlgmr.msra.gmra.mxu1 %vm171_vm2, %v1991_v3  ;;  %3852 = vmatmul.mubr.msk.f32.vlgmr.msra.gmra.mxu0 %vm171_vm2, %v2145_v4 }
 0xf3a   :  { %3855 = vmatpush3.xpose.msk.msra.mxu1 %vm171_vm2, %v2225_v62  ;;  %3856 = vmatprep.mubr.msk.f32.mxu1 %vm4067_vm1, %v4066_v6 }
 0xf3b   :  { %3864 = vmatprep.subr.mxu1 %v4066_v6  ;;  %3861 = vmatprep.mubr.msk.f32.mxu0 %vm4067_vm1, %v4066_v6 }
 0xf3d   :  { %3857 = vmatmul.mubr.msk.f32.vlgmr.msra.gmra.mxu1 %vm171_vm2, %v2223_v7 }
 0xf3e   :  { %3866 = vmatprep.mubr.msk.f32.mxu1 %vm4067_vm1, %v4066_v6 }
 0xff5   :  { %v4471_v8 = vpop.f32.mrf.mxu0 }
 0xff7   :  { %v3843_v9 = vpop.f32.mrf.mxu0 }
 0xff9   :  { %v4473_v12 = vpop.f32.mrf.mxu1  ;;  %v2218_v15 = vpop.f32.mrf.mxu0 }
 0xffa   :  { %v2219_v13 = vadd.f32 %v2218_v15, %v4433_v40 }
 0xffb   :  { %v3848_v14 = vpop.f32.mrf.mxu1  ;;  %v3853_v16 = vpop.f32.mrf.mxu0 }
 0xffc   :  { %v2300_v17 = vsel %vm171_vm2, %v2219_v13, -inf }
 0xffd   :  { %2301 = vmax.xlane.f32.xlu0 %v2300_v17  ;;  %v2296_v10 = vpop.f32.mrf.mxu1 }
 0xffe   :  { %v2297_v18 = vadd.f32 %v2296_v10, %v4433_v40 }
 0xfff   :  { %v3858_v19 = vpop.f32.mrf.mxu1 }
0x1000   :  { %v2303_v20 = vsel %vm171_vm2, %v2297_v18, -inf }
0x1001   :  { %2304 = vmax.xlane.f32.xlu1 %v2303_v20 }
0x1012   :  { %2322 = vrot.lane.b32.xlu1 %v4406_v33, %s4070_s2 }
0x1013   :  { %2398 = vrot.lane.b32.xlu0 %v4404_v31, %s4070_s2 }
0x1016   :  { %2476 = vrot.lane.b32.xlu1 %v4406_v33, %s4074_s24 }
0x101a   :  { %2554 = vrot.lane.b32.xlu1 %v4404_v31, %s4074_s24 }
0x101e   :  { %2552 = vrot.lane.b32.xlu1 %v4422_v38, %s4074_s24 }
0x1086   :  { %v2302_v21 = vpop.xlane.xlu0 %2301 }
0x1087   :  { %v2306_v22 = vsub.f32 %v2219_v13, %v2302_v21 }
0x1089   :  { %v2308_v23 = vmul.f32 1.442695, %v2306_v22 }
0x108a   :  { %v2399_v24 = vpop.permute.xlu0 %2398  ;;  %v2305_v25 = vpop.xlane.xlu1 %2304 }
0x108b   :  { %4012 = vpow2.f32 %v2308_v23  ;;  %v2307_v26 = vsub.f32 %v2297_v18, %v2305_v25  ;;  %3865 = vmatpush3.msra.mxu1 %v2399_v24 }
0x108c   :  { %3874 = vmatprep.subr.mxu1 %v4066_v6 }
0x108d   :  { %v2310_v11 = vmul.f32 1.442695, %v2307_v26 }
0x108e   :  { %v2323_v29 = vpop.permute.xlu1 %2322 }
0x108f   :  { %4014 = vpow2.f32 %v2310_v11  ;;  %3860 = vmatpush3.msra.mxu0 %v2323_v29 }
0x1090   :  { %3869 = vmatprep.subr.mxu0 %v4066_v6 }
0x1092   :  { %v2477_v41 = vpop.permute.xlu1 %2476 }
0x1096   :  { %v2555_v45 = vpop.permute.xlu1 %2554 }
0x1098   :  { %v4013_v30 = vpop.eup %4012 }
0x1099   :  { %v2312_v32 = vsel %vm171_vm2, %v4013_v30, 0.0 }
0x109a   :  { %2313 = vadd.xlane.f32.xlu0 %v2312_v32  ;;  %v2553_v49 = vpop.permute.xlu1 %2552 }
0x109c   :  { %v4015_v34 = vpop.eup %4014 }
0x109d   :  { %v2315_v35 = vsel %vm171_vm2, %v4015_v34, 0.0 }
0x109e   :  { %2316 = vadd.xlane.f32.xlu0 %v2315_v35 }
0x10b4   :  { %2474 = vrot.lane.b32.xlu0 %v4414_v37, %s4074_s24 }
0x1123   :  { %v2314_v36 = vpop.xlane.xlu0 %2313 }
0x1124   :  { %4016 = vrcp.f32 %v2314_v36 }
0x1127   :  { %v2317_v39 = vpop.xlane.xlu0 %2316 }
0x1128   :  { %4018 = vrcp.f32 %v2317_v39 }
0x112b   :  { %v2475_v46 = vpop.permute.xlu0 %2474 }
0x1131   :  { %v4017_v42 = vpop.eup %4016 }
0x1132   :  { %v2320_v43 = vmul.f32 %v4017_v42, %v4013_v30 }
0x1134   :  { %3862 = vmatmul.mubr.msk.f32.vlgmr.msra.gmra.mxu0 %vm171_vm2, %v2320_v43 }
0x1135   :  { %v4019_v44 = vpop.eup %4018  ;;  %3870 = vmatpush3.xpose.msk.msra.mxu0 %vm171_vm2, %v2477_v41  ;;  %3871 = vmatprep.mubr.msk.f32.mxu0 %vm4067_vm1, %v4066_v6 }
0x1136   :  { %v2321_v47 = vmul.f32 %v4019_v44, %v4015_v34  ;;  %3879 = vmatprep.subr.mxu0 %v4066_v6 }
0x1138   :  { %3867 = vmatmul.mubr.msk.f32.vlgmr.msra.gmra.mxu1 %vm171_vm2, %v2321_v47  ;;  %3872 = vmatmul.mubr.msk.f32.vlgmr.msra.gmra.mxu0 %vm171_vm2, %v2475_v46 }
0x1139   :  { %3875 = vmatpush3.xpose.msk.msra.mxu1 %vm171_vm2, %v2555_v45  ;;  %3876 = vmatprep.mubr.msk.f32.mxu1 %vm4067_vm1, %v4066_v6 }
0x113a   :  { %3884 = vmatprep.subr.mxu1 %v4066_v6  ;;  %3881 = vmatprep.mubr.msk.f32.mxu0 %vm4067_vm1, %v4066_v6 }
0x113c   :  { %3877 = vmatmul.mubr.msk.f32.vlgmr.msra.gmra.mxu1 %vm171_vm2, %v2553_v49 }
0x113d   :  { %3886 = vmatprep.mubr.msk.f32.mxu1 %vm4067_vm1, %v4066_v6 }
0x11f4   :  { %v4511_v50 = vpop.f32.mrf.mxu0 }
0x11f6   :  { %v3863_v51 = vpop.f32.mrf.mxu0 }
0x11f8   :  { %v4513_v52 = vpop.f32.mrf.mxu1  ;;  %v2548_v53 = vpop.f32.mrf.mxu0 }
0x11f9   :  { %v2549_v54 = vadd.f32 %v2548_v53, %v4433_v40 }
0x11fa   :  { %v3868_v48 = vpop.f32.mrf.mxu1  ;;  %v3873_v55 = vpop.f32.mrf.mxu0 }
0x11fb   :  { %v2630_v56 = vsel %vm171_vm2, %v2549_v54, -inf  ;;  %v52_v48 = vld [vmem:[%s4674_s6 + $0x50] sm:$0xff]  ;;  %v51_v55 = vld [vmem:[%s4674_s6 + $0x48] sm:$0xff] }
0x11fc   :  { %2631 = vmax.xlane.f32.xlu0 %v2630_v56  ;;  %v2626_v57 = vpop.f32.mrf.mxu1  ;;  %v50_v56 = vld [vmem:[%s4674_s6 + $0x40] sm:$0xff] }
0x11fd   :  { %v2627_v58 = vadd.f32 %v2626_v57, %v4433_v40 }
0x11fe   :  { %v3878_v59 = vpop.f32.mrf.mxu1 }
0x11ff   :  { %v2633_v60 = vsel %vm171_vm2, %v2627_v58, -inf }
0x1200   :  { %2634 = vmax.xlane.f32.xlu1 %v2633_v60 }
0x1211   :  { %2652 = vrot.lane.b32.xlu1 %v4406_v33, %s4073_s23 }
0x1212   :  { %2728 = vrot.lane.b32.xlu0 %v4404_v31, %s4073_s23 }
0x1215   :  { %2806 = vrot.lane.b32.xlu1 %v4406_v33, %s4077_s27 }
0x1219   :  { %2884 = vrot.lane.b32.xlu1 %v4404_v31, %s4077_s27 }
0x121d   :  { %2882 = vrot.lane.b32.xlu1 %v4422_v38, %s4077_s27 }
0x1285   :  { %v2632_v61 = vpop.xlane.xlu0 %2631 }
0x1286   :  { %v2636_v62 = vsub.f32 %v2549_v54, %v2632_v61 }
0x1288   :  { %v2638_v63 = vmul.f32 1.442695, %v2636_v62 }
0x1289   :  { %v2729_v0 = vpop.permute.xlu0 %2728  ;;  %v2635_v5 = vpop.xlane.xlu1 %2634 }
0x128a   :  { %4020 = vpow2.f32 %v2638_v63  ;;  %v2637_v2 = vsub.f32 %v2627_v58, %v2635_v5  ;;  %3885 = vmatpush3.msra.mxu1 %v2729_v0 }
0x128b   :  { %3894 = vmatprep.subr.mxu1 %v4066_v6 }
0x128c   :  { %v2640_v1 = vmul.f32 1.442695, %v2637_v2 }
0x128d   :  { %v2653_v3 = vpop.permute.xlu1 %2652 }
0x128e   :  { %4022 = vpow2.f32 %v2640_v1  ;;  %3880 = vmatpush3.msra.mxu0 %v2653_v3 }
0x128f   :  { %3889 = vmatprep.subr.mxu0 %v4066_v6 }
0x1291   :  { %v2807_v14 = vpop.permute.xlu1 %2806 }
0x1295   :  { %v2885_v18 = vpop.permute.xlu1 %2884 }
0x1297   :  { %v4021_v4 = vpop.eup %4020 }
0x1298   :  { %v2642_v7 = vsel %vm171_vm2, %v4021_v4, 0.0 }
0x1299   :  { %2643 = vadd.xlane.f32.xlu0 %v2642_v7  ;;  %v2883_v20 = vpop.permute.xlu1 %2882 }
0x129b   :  { %v4023_v38 = vpop.eup %4022 }
0x129c   :  { %v2645_v9 = vsel %vm171_vm2, %v4023_v38, 0.0 }
0x129d   :  { %2646 = vadd.xlane.f32.xlu0 %v2645_v9 }
0x12b3   :  { %2804 = vrot.lane.b32.xlu0 %v4414_v37, %s4077_s27 }
0x1322   :  { %v2644_v15 = vpop.xlane.xlu0 %2643 }
0x1323   :  { %4024 = vrcp.f32 %v2644_v15 }
0x1326   :  { %v2647_v13 = vpop.xlane.xlu0 %2646 }
0x1327   :  { %4026 = vrcp.f32 %v2647_v13 }
0x132a   :  { %v2805_v37 = vpop.permute.xlu0 %2804 }
0x1330   :  { %v4025_v16 = vpop.eup %4024 }
0x1331   :  { %v2650_v17 = vmul.f32 %v4025_v16, %v4021_v4 }
0x1333   :  { %3882 = vmatmul.mubr.msk.f32.vlgmr.msra.gmra.mxu0 %vm171_vm2, %v2650_v17 }
0x1334   :  { %v4027_v10 = vpop.eup %4026  ;;  %3890 = vmatpush3.xpose.msk.msra.mxu0 %vm171_vm2, %v2807_v14  ;;  %3891 = vmatprep.mubr.msk.f32.mxu0 %vm4067_vm1, %v4066_v6 }
0x1335   :  { %v2651_v19 = vmul.f32 %v4027_v10, %v4023_v38  ;;  %3899 = vmatprep.subr.mxu0 %v4066_v6 }
0x1337   :  { %3887 = vmatmul.mubr.msk.f32.vlgmr.msra.gmra.mxu1 %vm171_vm2, %v2651_v19  ;;  %3892 = vmatmul.mubr.msk.f32.vlgmr.msra.gmra.mxu0 %vm171_vm2, %v2805_v37 }
0x1338   :  { %3895 = vmatpush3.xpose.msk.msra.mxu1 %vm171_vm2, %v2885_v18  ;;  %3896 = vmatprep.mubr.msk.f32.mxu1 %vm4067_vm1, %v4066_v6 }
0x1339   :  { %3904 = vmatprep.subr.mxu1 %v4066_v6  ;;  %3901 = vmatprep.mubr.msk.f32.mxu0 %vm4067_vm1, %v4066_v6 }
0x133b   :  { %3897 = vmatmul.mubr.msk.f32.vlgmr.msra.gmra.mxu1 %vm171_vm2, %v2883_v20 }
0x133c   :  { %3906 = vmatprep.mubr.msk.f32.mxu1 %vm4067_vm1, %v4066_v6 }
0x13f3   :  { %v2724_v21 = vpop.f32.mrf.mxu0 }
0x13f5   :  { %v3883_v22 = vpop.f32.mrf.mxu0 }
0x13f7   :  { %v2800_v23 = vpop.f32.mrf.mxu1  ;;  %v2878_v24 = vpop.f32.mrf.mxu0 }
0x13f8   :  { %v2879_v25 = vadd.f32 %v2878_v24, %v4433_v40 }
0x13f9   :  { %v3888_v26 = vpop.f32.mrf.mxu1  ;;  %v3893_v11 = vpop.f32.mrf.mxu0 }
0x13fa   :  { %v2960_v29 = vsel %vm171_vm2, %v2879_v25, -inf  ;;  %v40_v11 = vld [vmem:[%s4673_s5 + $0x30] sm:$0xff] }
0x13fb   :  { %2961 = vmax.xlane.f32.xlu0 %v2960_v29  ;;  %v2956_v30 = vpop.f32.mrf.mxu1  ;;  %v39_v29 = vld [vmem:[%s4673_s5 + $0x28] sm:$0xff] }
0x13fc   :  { %v2957_v32 = vadd.f32 %v2956_v30, %v4433_v40  ;;  %v38_v30 = vld [vmem:[%s4673_s5 + $0x20] sm:$0xff] }
0x13fd   :  { %v3898_v34 = vpop.f32.mrf.mxu1 }
0x13fe   :  { %v2963_v35 = vsel %vm171_vm2, %v2957_v32, -inf  ;;  %v60_v34 = vld [vmem:[%s4674_s6 + $0x90] sm:$0xff] }
0x13ff   :  { %2964 = vmax.xlane.f32.xlu1 %v2963_v35  ;;  %v59_v35 = vld [vmem:[%s4674_s6 + $0x88] sm:$0xff] }
0x1410   :  { %2982 = vrot.lane.b32.xlu1 %v4406_v33, %s4076_s26 }
0x1414   :  { %3136 = vrot.lane.b32.xlu1 %v4511_v50, %s4079_s29 }
0x1418   :  { %3138 = vrot.lane.b32.xlu1 %v4513_v52, %s4079_s29 }
0x141c   :  { %3146 = vrot.lane.b32.xlu1 %v2800_v23, %s4080_s30 }
0x1484   :  { %v2962_v6 = vpop.xlane.xlu0 %2961 }
0x1485   :  { %v2966_v36 = vsub.f32 %v2879_v25, %v2962_v6  ;;  %v58_v6 = vld [vmem:[%s4674_s6 + $0x80] sm:$0xff] }
0x1487   :  { %v2968_v39 = vmul.f32 1.442695, %v2966_v36 }
0x1488   :  { %v2965_v41 = vpop.xlane.xlu1 %2964 }
0x1489   :  { %4028 = vpow2.f32 %v2968_v39  ;;  %v2967_v40 = vsub.f32 %v2957_v32, %v2965_v41  ;;  %v61_v32 = vld [vmem:[%s4674_s6 + $0x98] sm:$0xff] }
0x148b   :  { %v2970_v42 = vmul.f32 1.442695, %v2967_v40 }
0x148c   :  { %v2983_v43 = vpop.permute.xlu1 %2982 }
0x148d   :  { %4030 = vpow2.f32 %v2970_v42  ;;  %3900 = vmatpush3.msra.mxu0 %v2983_v43 }
0x1490   :  { %v3137_v61 = vpop.permute.xlu1 %3136 }
0x1491   :  { %v3158_v0 = vsel %vm171_vm2, %v4471_v8, %v3137_v61  ;;  %v3582_v8 = vld [vmem:[%s4675_s7 + $0x4] ss:$0 sm:$0xff] }
0x1494   :  { %v3139_v62 = vpop.permute.xlu1 %3138 }
0x1495   :  { %v3159_v4 = vsel %vm171_vm2, %v4473_v12, %v3139_v62 }
0x1496   :  { %v4029_v44 = vpop.eup %4028 }
0x1497   :  { %v2972_v33 = vsel %vm171_vm2, %v4029_v44, 0.0 }
0x1498   :  { %2973 = vadd.xlane.f32.xlu0 %v2972_v33  ;;  %v3147_v5 = vpop.permute.xlu1 %3146  ;;  %v3585_v33 = vld [vmem:[%s4675_s7 + $0x9] ss:$0 sm:$0xff] }
0x1499   :  { %v3161_v7 = vsel %vm1513_vm5, %v3159_v4, %v3147_v5 }
0x149a   :  { %v4031_v45 = vpop.eup %4030 }
0x149b   :  { %v2975_v47 = vsel %vm171_vm2, %v4031_v45, 0.0 }
0x149c   :  { %2976 = vadd.xlane.f32.xlu0 %v2975_v47  ;;  %v3586_v47 = vld [vmem:[%s4675_s7 + $0xa] ss:$0 sm:$0xff] }
0x14b2   :  { %3058 = vrot.lane.b32.xlu0 %v4404_v31, %s4076_s26  ;;  %v53_v31 = vld [vmem:[%s4674_s6 + $0x58] sm:$0xff] }
0x14b3   :  { %3909 = vmatprep.subr.mxu0 %v53_v31 }
0x14b6   :  { %3144 = vrot.lane.b32.xlu0 %v2724_v21, %s4080_s30 }
0x1521   :  { %v2974_v46 = vpop.xlane.xlu0 %2973 }
0x1522   :  { %4032 = vrcp.f32 %v2974_v46 }
0x1525   :  { %v2977_v49 = vpop.xlane.xlu0 %2976 }
0x1526   :  { %4034 = vrcp.f32 %v2977_v49 }
0x1529   :  { %v3059_v50 = vpop.permute.xlu0 %3058 }
0x152a   :  { %3905 = vmatpush3.msra.mxu1 %v3059_v50 }
0x152d   :  { %v3145_v63 = vpop.permute.xlu0 %3144 }
0x152e   :  { %v3160_v2 = vsel %vm1513_vm5, %v3158_v0, %v3145_v63  ;;  %v3590_v63 = vld [vmem:[%s4675_s7 + $0x6] ss:$0 sm:$0xff] }
0x152f   :  { %v4033_v51 = vpop.eup %4032 }
0x1530   :  { %v2980_v52 = vmul.f32 %v4033_v51, %v4029_v44 }
0x1532   :  { %3902 = vmatmul.mubr.msk.f32.vlgmr.msra.gmra.mxu0 %vm171_vm2, %v2980_v52 }
0x1533   :  { %v4035_v53 = vpop.eup %4034  ;;  %3910 = vmatpush3.msra.mxu0 %v53_v31  ;;  %v56_v31 = vld [vmem:[%s4674_s6 + $0x70] sm:$0xff] }
0x1534   :  { %v2981_v54 = vmul.f32 %v4035_v53, %v4031_v45  ;;  %3911 = vmatprep.subr.mxu0 %v52_v48 }
0x1535   :  { %3912 = vmatpush3.msra.mxu0 %v52_v48  ;;  %v55_v48 = vld [vmem:[%s4674_s6 + $0x68] sm:$0xff] }
0x1536   :  { %3907 = vmatmul.mubr.msk.f32.vlgmr.msra.gmra.mxu1 %vm171_vm2, %v2981_v54  ;;  %3913 = vmatprep.subr.mxu0 %v51_v55  ;;  %v57_v54 = vld [vmem:[%s4674_s6 + $0x78] sm:$0xff] }
0x1537   :  { %3914 = vmatpush3.msra.mxu0 %v51_v55  ;;  %v54_v55 = vld [vmem:[%s4674_s6 + $0x60] sm:$0xff] }
0x1538   :  { %3915 = vmatprep.subr.mxu0 %v50_v56 }
0x1539   :  { %3916 = vmatpush3.msra.mxu0 %v50_v56  ;;  %v3587_v56 = vld [vmem:[%s4675_s7 + $0x5] ss:$0 sm:$0xff] }
0x153a   :  { %3931 = vmatprep.subr.mxu0 %v61_v32 }
0x15f2   :  { %v3054_v57 = vpop.f32.mrf.mxu0 }
0x15f3   :  { %3152 = vrot.lane.b32.xlu0 %v3054_v57, %s4081_s0 }
0x15f4   :  { %v3903_v58 = vpop.f32.mrf.mxu0 }
0x15f6   :  { %v3130_v59 = vpop.f32.mrf.mxu1 }
0x15f7   :  { %3154 = vrot.lane.b32.xlu1 %v3130_v59, %s4081_s0 }
0x15f8   :  { %v3908_v60 = vpop.f32.mrf.mxu1 }
0x1665   :  { %v3153_v1 = vpop.permute.xlu0 %3152 }
0x1666   :  { %v3162_v3 = vsel %vm1516_vm4, %v3160_v2, %v3153_v1 }
0x1667   :  { %3917 = vmatprep.mubr.msk.f32.mxu0 %vm83_vm0, %v3162_v3 }
0x1669   :  { %v3155_v38 = vpop.permute.xlu1 %3154 }
0x166a   :  { %v3163_v9 = vsel %vm1516_vm4, %v3161_v7, %v3155_v38 }
0x166b   :  { %3918 = vmatmul.mubr.msk.f32.vlgmr.msra.gmra.mxu0 %vm83_vm0, %v3163_v9 }
0x166c   :  { %3932 = vmatpush3.msra.mxu0 %v61_v32 }
0x166d   :  { %3933 = vmatprep.subr.mxu0 %v60_v34 }
0x166e   :  { %3934 = vmatpush3.msra.mxu0 %v60_v34 }
0x166f   :  { %3935 = vmatprep.subr.mxu0 %v59_v35 }
0x1670   :  { %3936 = vmatpush3.msra.mxu0 %v59_v35 }
0x1671   :  { %3937 = vmatprep.subr.mxu0 %v58_v6 }
0x1672   :  { %3938 = vmatpush3.msra.mxu0 %v58_v6 }
0x1673   :  { %3939 = vmatprep.subr.mxu0 %v57_v54 }
0x1674   :  { %3940 = vmatpush3.msra.mxu0 %v57_v54 }
0x1675   :  { %3941 = vmatprep.subr.mxu0 %v56_v31 }
0x1676   :  { %3942 = vmatpush3.msra.mxu0 %v56_v31 }
0x1677   :  { %3943 = vmatprep.subr.mxu0 %v55_v48 }
0x1678   :  { %3944 = vmatpush3.msra.mxu0 %v55_v48 }
0x1679   :  { %3945 = vmatprep.subr.mxu0 %v54_v55 }
0x167a   :  { %3946 = vmatpush3.msra.mxu0 %v54_v55 }
0x172b   :  { %v3919_v15 = vpop.f32.mrf.mxu0 }
0x172c   :  { %v3246_v13 = vadd.f32 %v3919_v15, %v3582_v8 }
0x172d   :  { %v3240_v14 = vpop.f32.mrf.mxu0 }
0x172e   :  { %v3250_v16 = vadd.f32 %v3246_v13, %v4395_v28  ;;  %v3241_v17 = vadd.f32 %v3582_v8, %v3240_v14 }
0x1730   :  { %v3254_v10 = vsel %vm83_vm0, %v3250_v16, 0.0  ;;  %v3249_v12 = vadd.f32 %v3241_v17, %v4391_v27  ;;  %v41_v27 = vld [vmem:[%s4673_s5 + $0x38] sm:$0xff] }
0x1731   :  { %3255 = vadd.xlane.f32.xlu1 %v3254_v10  ;;  %3920 = vmatprep.subr.mxu1 %v41_v27 }
0x1732   :  { %v3251_v18 = vsel %vm83_vm0, %v3249_v12, 0.0  ;;  %3921 = vmatpush3.msra.mxu1 %v41_v27  ;;  %v3594_v27 = vld [vmem:[%s4675_s7 + $0xc] ss:$0 sm:$0xff] }
0x1733   :  { %3252 = vadd.xlane.f32.xlu0 %v3251_v18  ;;  %3922 = vmatprep.subr.mxu1 %v40_v11 }
0x1734   :  { %3923 = vmatpush3.msra.mxu1 %v40_v11 }
0x1735   :  { %3924 = vmatprep.subr.mxu1 %v39_v29 }
0x1736   :  { %3925 = vmatpush3.msra.mxu1 %v39_v29 }
0x1737   :  { %3926 = vmatprep.subr.mxu1 %v38_v30 }
0x1738   :  { %3927 = vmatpush3.msra.mxu1 %v38_v30 }
0x17ba   :  { %v3256_v19 = vpop.xlane.xlu1 %3255 }
0x17bb   :  { %v3258_v37 = vmul.f32 0.03125, %v3256_v19 }
0x17bc   :  { %v3253_v20 = vpop.xlane.xlu0 %3252 }
0x17bd   :  { %v3257_v21 = vmul.f32 0.03125, %v3253_v20  ;;  %v3260_v22 = vsub.f32 %v3250_v16, %v3258_v37 }
0x17bf   :  { %v3259_v23 = vsub.f32 %v3249_v12, %v3257_v21  ;;  %v3262_v26 = vmul.f32 %v3260_v22, %v3260_v22 }
0x17c1   :  { %v3261_v24 = vmul.f32 %v3259_v23, %v3259_v23  ;;  %v3266_v28 = vsel %vm83_vm0, %v3262_v26, 0.0 }
0x17c3   :  { %v3263_v25 = vsel %vm83_vm0, %v3261_v24, 0.0 }
0x17c4   :  { %3264 = vadd.xlane.f32.xlu0 %v3263_v25  ;;  %v3593_v25 = vld [vmem:[%s4675_s7 + $0xb] ss:$0 sm:$0xff] }
0x17c8   :  { %3267 = vadd.xlane.f32.xlu0 %v3266_v28 }
0x184d   :  { %v3265_v36 = vpop.xlane.xlu0 %3264 }
0x184e   :  { %v3269_v39 = vmul.f32 0.03125, %v3265_v36 }
0x1850   :  { %v3271_v41 = vadd.f32 1e-05, %v3269_v39 }
0x1851   :  { %v3268_v40 = vpop.xlane.xlu0 %3267 }
0x1852   :  { %4036 = vrsqrt.f32 %v3271_v41  ;;  %v3270_v42 = vmul.f32 0.03125, %v3268_v40 }
0x1854   :  { %v3272_v43 = vadd.f32 1e-05, %v3270_v42 }
0x1856   :  { %4038 = vrsqrt.f32 %v3272_v43 }
0x185f   :  { %v4037_v44 = vpop.eup %4036 }
0x1860   :  { %v3275_v45 = vmul.f32 %v4037_v44, %v3259_v23 }
0x1862   :  { %v3281_v46 = vmul.f32 %v3585_v33, %v3275_v45 }
0x1863   :  { %v4039_v49 = vpop.eup %4038 }
0x1864   :  { %v3276_v50 = vmul.f32 %v4039_v49, %v3260_v22  ;;  %v3287_v51 = vadd.f32 %v3586_v47, %v3281_v46 }
0x1866   :  { %v3282_v52 = vmul.f32 %v3585_v33, %v3276_v50  ;;  %3928 = vmatprep.mubr.msk.f32.mxu1 %vm83_vm0, %v3287_v51 }
0x1868   :  { %v3288_v53 = vadd.f32 %v3586_v47, %v3282_v52 }
0x186a   :  { %3929 = vmatmul.mubr.msk.f32.vlgmr.msra.gmra.mxu1 %vm83_vm0, %v3288_v53 }
0x192a   :  { %v3930_v57 = vpop.f32.mrf.mxu1 }
0x192b   :  { %v3371_v58 = vadd.f32 %v3930_v57, %v3587_v56 }
0x192c   :  { %v3365_v59 = vpop.f32.mrf.mxu1 }
0x192d   :  { %v3366_v60 = vadd.f32 %v3587_v56, %v3365_v59  ;;  %v3375_v62 = vmax.f32 %v3371_v58, 0.0 }
0x192f   :  { %v3374_v61 = vmax.f32 %v3366_v60, 0.0 }
0x1931   :  { %3947 = vmatprep.mubr.msk.f32.mxu0 %vm3380_vm7, %v3374_v61 }
0x1932   :  { %3948 = vmatmul.mubr.msk.f32.vlgmr.msra.gmra.mxu0 %vm3380_vm7, %v3375_v62 }
0x19f2   :  { %v3949_v0 = vpop.f32.mrf.mxu0 }
0x19f3   :  { %v3459_v5 = vadd.f32 %v3949_v0, %v3590_v63 }
0x19f4   :  { %v3453_v2 = vpop.f32.mrf.mxu0 }
0x19f5   :  { %v3454_v1 = vadd.f32 %v3590_v63, %v3453_v2  ;;  %v3463_v3 = vadd.f32 %v3459_v5, %v3288_v53 }
0x19f7   :  { %v3462_v4 = vadd.f32 %v3454_v1, %v3287_v51  ;;  %v3467_v7 = vsel %vm83_vm0, %v3463_v3, 0.0 }
0x19f8   :  { %3468 = vadd.xlane.f32.xlu0 %v3467_v7 }
0x19f9   :  { %v3464_v38 = vsel %vm83_vm0, %v3462_v4, 0.0 }
0x19fa   :  { %3465 = vadd.xlane.f32.xlu1 %v3464_v38 }
0x1a81   :  { %v3469_v9 = vpop.xlane.xlu0 %3468 }
0x1a82   :  { %v3471_v8 = vmul.f32 0.03125, %v3469_v9 }
0x1a83   :  { %v3466_v15 = vpop.xlane.xlu1 %3465 }
0x1a84   :  { %v3473_v13 = vsub.f32 %v3463_v3, %v3471_v8  ;;  %v3470_v14 = vmul.f32 0.03125, %v3466_v15 }
0x1a86   :  { %v3472_v16 = vsub.f32 %v3462_v4, %v3470_v14  ;;  %v3475_v17 = vmul.f32 %v3473_v13, %v3473_v13 }
0x1a88   :  { %v3479_v10 = vsel %vm83_vm0, %v3475_v17, 0.0  ;;  %v3474_v12 = vmul.f32 %v3472_v16, %v3472_v16 }
0x1a89   :  { %3480 = vadd.xlane.f32.xlu0 %v3479_v10 }
0x1a8a   :  { %v3476_v18 = vsel %vm83_vm0, %v3474_v12, 0.0 }
0x1a8b   :  { %3477 = vadd.xlane.f32.xlu1 %v3476_v18 }
0x1b12   :  { %v3481_v19 = vpop.xlane.xlu0 %3480 }
0x1b13   :  { %v3483_v37 = vmul.f32 0.03125, %v3481_v19 }
0x1b14   :  { %v3478_v20 = vpop.xlane.xlu1 %3477 }
0x1b15   :  { %v3485_v21 = vadd.f32 1e-05, %v3483_v37  ;;  %v3482_v22 = vmul.f32 0.03125, %v3478_v20 }
0x1b17   :  { %4040 = vrsqrt.f32 %v3485_v21  ;;  %v3484_v23 = vadd.f32 1e-05, %v3482_v22 }
0x1b19   :  { %4042 = vrsqrt.f32 %v3484_v23 }
0x1b24   :  { %v4041_v24 = vpop.eup %4040 }
0x1b25   :  { %v3489_v26 = vmul.f32 %v4041_v24, %v3473_v13 }
0x1b26   :  { %v4043_v28 = vpop.eup %4042 }
0x1b27   :  { %v3488_v11 = vmul.f32 %v4043_v28, %v3472_v16  ;;  %v3495_v29 = vmul.f32 %v3593_v25, %v3489_v26 }
0x1b29   :  { %v3494_v30 = vmul.f32 %v3593_v25, %v3488_v11  ;;  %v3501_v32 = vadd.f32 %v3594_v27, %v3495_v29 }
0x1b2b   :  { %v3500_v34 = vadd.f32 %v3594_v27, %v3494_v30  ;;  %3503 = vst.msk [vmem:[#allocation2 + $0x8] sm:$0xff] %vm83_vm0, %v3501_v32 }
0x1b2d   :  { %3502 = vst.msk [vmem:[#allocation2] sm:$0xff] %vm83_vm0, %v3500_v34 }
0x1b2e   :  { %4055 = shalt.err (!%p4052_p4)
}
0x1b2f   :  { %s4083_s7 = smov 128  }
0x1b30   :  { %3515 = dma.vmem_to_hbm [thread:$0]  %s3510_s11, 256, %s4676_s8, [#allocation3], %s4083_s7, %s4083_s7, %s4079_s29  }
0x1b31   :  { %4064 = dma.done.wait [#allocation3], 256  }
0x1b32   :  { %4065 = vsyncadd [#allocation3], 4294967040 }
0x1b33   :  { %3519 = vsyncpa [#allocation3], 1 }

</bundles_post_ra>
